<compile_context>
chip_gen: v7x
topology: tpu7x:2x2x1
jax: 0.10.0
libtpu: 0.0.40
codegen_flags: <defaults>
</compile_context>

<pallas_src>
import functools

import numpy as np
import jax
import jax.numpy as jnp
from jax.experimental import pallas as pl
from jax.experimental.pallas import tpu as pltpu


def _round_up(x, m):
    return ((x + m - 1) // m) * m


def _geometry(h_in, w_in, up_factor):
    """Canvas geometry shared by the host-side builders and the wrapper."""
    h_up, w_up = h_in * up_factor, w_in * up_factor
    # Padded row width: >= w_up + 2 (left/right conv pad cols) and such that
    # the extended output width hext = h_up * w_p is lane-dense (mult of 128).
    w_p = w_up + 2
    while (h_up * w_p) % 128 != 0:
        w_p += 1
    hext = h_up * w_p
    # Leading canvas offset so the inter-layer writeback start (lead + w_p + 1)
    # is 128-aligned -> unmasked stores for the biggest recurring store.
    lead = (-(w_p + 1)) % 128
    canvas_len = _round_up(lead + 2 * w_p + 2 + hext, 128)
    return h_up, w_up, w_p, hext, lead, canvas_len


# ----------------------------------------------------------------------------
# Fused kernel body (static shapes baked in via closure).
# ----------------------------------------------------------------------------
def _make_kernel(num_repeats, c_max, c_out, h_in, up_factor, w_p, hext, lead,
                 canvas_len):
    interior_off = lead + w_p          # flat offset of canvas row 1, col 0
    wb_off = lead + w_p + 1            # 128-aligned inter-layer writeback start
    row_chunk = up_factor * w_p        # flat length of the up_factor canvas
                                       # rows produced by one input row

    def kernel(x_ref, colrep_ref, mask_ref, w_ref, b_ref, o_ref, canvas_ref):
        # x_ref:      (1, H_in*Cmax, W_in)  input, rows ordered (h, c), channels
        #                                   zero-padded up to Cmax
        # colrep_ref: (W_in, up*W_p)        0/1 separable upsample+pad matrix
        # mask_ref:   (1, hext)             1.0 on valid cols, 0.0 on junk cols
        # w_ref:      (R*9, Cout, Cmax)     per-tap weights, BN scale folded in,
        #                                   zero beyond each layer's true c_in
        #                                   (so stale canvas rows cannot leak)
        # b_ref:      (R, Cout, 1)          folded BN bias
        # o_ref:      (1, Cout, hext)       extended-width output; junk columns
        #                                   are garbage until the wrapper slice
        # canvas_ref: (Cmax, canvas_len)    zero-padded flat activation canvas

        # --- nearest upsample (separable): zero canvas, column-place, then ---
        # --- replicate rows with aligned sublane-block stores              ---
        canvas_ref[...] = jnp.zeros((c_max, canvas_len), jnp.float32)
        up_rows = jnp.dot(x_ref[0].astype(jnp.float32), colrep_ref[...],
                          preferred_element_type=jnp.float32)
        # up_rows[h*Cmax + c, :] holds the `up_factor` replicated, zero-padded
        # canvas rows for input row h / channel c -> one contiguous flat chunk.
        for h in range(h_in):
            canvas_ref[:, interior_off + h * row_chunk:
                          interior_off + (h + 1) * row_chunk] = (
                up_rows[h * c_max:(h + 1) * c_max, :])

        # --- num_repeats x (3x3 conv + bias + ReLU), activations stay in VMEM
        for layer in range(num_repeats):
            acc = jnp.zeros((c_out, hext), jnp.float32)
            # 9 accumulating tap matmuls; each tap is a lane-shifted *load* of
            # the canvas (no im2col scratch).  The MXU is nowhere near the
            # bottleneck here, so K=Cmax per matmul is immaterial — the point
            # is removing the col_ref VMEM round trip.
            for kh in range(3):
                for kw in range(3):
                    tap = kh * 3 + kw
                    start = lead + kh * w_p + kw
                    acc = acc + jnp.dot(
                        w_ref[layer * 9 + tap],
                        canvas_ref[:, start:start + hext],
                        preferred_element_type=jnp.float32)
            y = jnp.maximum(acc + b_ref[layer], 0.0)

            if layer < num_repeats - 1:
                # 128-aligned writeback of the next layer's padded input.
                # Masked junk columns land exactly on pad columns, so the
                # canvas zero-padding is preserved across layers.  Channels
                # c_out..Cmax-1 (if any) keep stale data, which is harmless
                # because later-layer weights are zero there.
                canvas_ref[0:c_out, wb_off:wb_off + hext] = y * mask_ref[...]
            else:
                o_ref[0] = y.astype(o_ref.dtype)

    return kernel


# ----------------------------------------------------------------------------
# Host-side operand preparation.
# ----------------------------------------------------------------------------
def build_constants(h_in, w_in, up_factor):
    """Tiny separable upsample matrix + valid-column mask (both KB-sized)."""
    h_up, w_up, w_p, hext, lead, canvas_len = _geometry(h_in, w_in, up_factor)

    # colrep[w, dh*W_p + 1 + up*w + dw] = 1: one input row -> `up_factor`
    # upsampled, zero-padded canvas rows laid out contiguously.
    colrep = np.zeros((w_in, up_factor * w_p), np.float32)
    for w in range(w_in):
        for dh in range(up_factor):
            for dw in range(up_factor):
                colrep[w, dh * w_p + 1 + up_factor * w + dw] = 1.0

    mask = np.zeros((1, hext), np.float32)
    for h in range(h_up):
        mask[0, h * w_p:h * w_p + w_up] = 1.0
    return jnp.asarray(colrep), jnp.asarray(mask)


def init_params_torch_layout(key, in_channels, out_channels, num_repeats,
                             eps=1e-5):
    """Synthetic per-layer (conv_w, bn_scale, bn_bias) in PyTorch layouts.

    Conv: 3x3, bias=False.  BN (eval): running_mean=0, running_var=1,
    gamma/beta random -> folded into per-channel scale/bias."""
    params = []
    cin = in_channels
    for _ in range(num_repeats):
        key, kw, kg, kb = jax.random.split(key, 4)
        w = 0.1 * jax.random.normal(kw, (out_channels, cin, 3, 3), jnp.float32)
        gamma = 1.0 + 0.05 * jax.random.normal(kg, (out_channels,), jnp.float32)
        beta = 0.05 * jax.random.normal(kb, (out_channels,), jnp.float32)
        running_mean = jnp.zeros((out_channels,), jnp.float32)
        running_var = jnp.ones((out_channels,), jnp.float32)
        scale = gamma / jnp.sqrt(running_var + eps)
        bias = beta - running_mean * scale
        params.append((w, scale, bias))
        cin = out_channels
    return params


def pack_params(params_torch, in_channels, out_channels):
    """Per-tap conv weights with the BN scale folded in, plus folded BN bias.

    w_taps[l*9 + kh*3 + kw, o, c] = scale[l, o] * W_torch[l][o, c, kh, kw];
    entries with c >= that layer's true in-channels stay exactly zero so stale
    canvas rows can never leak into later layers."""
    num_repeats = len(params_torch)
    c_max = max(in_channels, out_channels)
    w_taps = np.zeros((num_repeats * 9, out_channels, c_max), np.float32)
    biases = np.zeros((num_repeats, out_channels, 1), np.float32)
    cin = in_channels
    for l, (w, s, b) in enumerate(params_torch):
        w_np = np.asarray(w) * np.asarray(s)[:, None, None, None]  # fold BN scale
        for kh in range(3):
            for kw in range(3):
                w_taps[l * 9 + kh * 3 + kw, :, :cin] = w_np[:, :, kh, kw]
        biases[l, :, 0] = np.asarray(b)
        cin = out_channels
    return jnp.asarray(w_taps), jnp.asarray(biases)


# ----------------------------------------------------------------------------
# Forward wrapper (matches UpFactorBlock.forward(x, skip); skip is ignored).
# ----------------------------------------------------------------------------
@functools.partial(jax.jit, static_argnames=("up_factor",))
def up_factor_block_forward(x_nchw, colrep, mask, w_taps, biases, *, up_factor):
    n, c_in, h_in, w_in = x_nchw.shape
    r9, c_out, c_max = w_taps.shape
    num_repeats = r9 // 9
    assert r9 == num_repeats * 9 and c_max >= c_in
    h_up, w_up, w_p, hext, lead, canvas_len = _geometry(h_in, w_in, up_factor)
    assert colrep.shape == (w_in, up_factor * w_p)
    assert mask.shape == (1, hext)

    # Zero-pad channels to Cmax and order rows as (h, c) so the kernel places
    # each input row's channels with one aligned sublane-block store.  This is
    # the tiny pre-upsample tensor; the big upsampled activation never leaves
    # the kernel's VMEM canvas.
    x_pad = x_nchw
    if c_max > c_in:
        x_pad = jnp.pad(x_pad, ((0, 0), (0, c_max - c_in), (0, 0), (0, 0)))
    x_hc = jnp.transpose(x_pad, (0, 2, 1, 3)).reshape(n, h_in * c_max, w_in)

    kernel = _make_kernel(num_repeats, c_max, c_out, h_in, up_factor, w_p,
                          hext, lead, canvas_len)

    out_ext = pl.pallas_call(
        kernel,
        out_shape=jax.ShapeDtypeStruct((n, c_out, hext), x_nchw.dtype),
        grid_spec=pltpu.PrefetchScalarGridSpec(
            num_scalar_prefetch=0,
            grid=(n,),
            in_specs=[
                pl.BlockSpec((1, h_in * c_max, w_in), lambda i: (i, 0, 0)),
                pl.BlockSpec((w_in, up_factor * w_p), lambda i: (0, 0)),
                pl.BlockSpec((1, hext), lambda i: (0, 0)),
                pl.BlockSpec((num_repeats * 9, c_out, c_max),
                             lambda i: (0, 0, 0)),
                pl.BlockSpec((num_repeats, c_out, 1), lambda i: (0, 0, 0)),
            ],
            out_specs=pl.BlockSpec((1, c_out, hext), lambda i: (i, 0, 0)),
            scratch_shapes=[
                pltpu.VMEM((c_max, canvas_len), jnp.float32),  # padded canvas
            ],
        ),
        compiler_params=pltpu.CompilerParams(
            dimension_semantics=("parallel",),
        ),
    )(x_hc, colrep, mask, w_taps, biases)

    # Free reshape + cheap slice dropping the junk columns per row -> NCHW.
    return out_ext.reshape(n, c_out, h_up, w_p)[:, :, :, :w_up]


# ----------------------------------------------------------------------------
# Pure-JAX reference (f32 / HIGHEST precision, for a tight correctness check).
# ----------------------------------------------------------------------------
def reference_forward(x_nchw, params_torch, up_factor):
    x = jnp.repeat(jnp.repeat(x_nchw, up_factor, axis=2), up_factor, axis=3)
    for (w, scale, bias) in params_torch:
        x = jax.lax.conv_general_dilated(
            x, w, window_strides=(1, 1), padding=((1, 1), (1, 1)),
            dimension_numbers=("NCHW", "OIHW", "NCHW"),
            precision=jax.lax.Precision.HIGHEST)
        x = x * scale[None, :, None, None] + bias[None, :, None, None]
        x = jnp.maximum(x, 0.0)
    return x


if __name__ == "__main__":
    # Small shapes consistent with the module.
    N, IN_CH, H, W = 2, 4, 16, 16
    OUT_CH = 8
    UP_FACTOR = 2
    NUM_REPEATS = 2

    key = jax.random.PRNGKey(0)
    key, kx = jax.random.split(key)
    x = jax.random.normal(kx, (N, IN_CH, H, W), jnp.float32)   # NCHW input

    params_torch = init_params_torch_layout(key, IN_CH, OUT_CH, NUM_REPEATS)
    w_taps, biases = pack_params(params_torch, IN_CH, OUT_CH)
    colrep, mask = build_constants(H, W, UP_FACTOR)

    out = up_factor_block_forward(x, colrep, mask, w_taps, biases,
                                  up_factor=UP_FACTOR)
    out = jax.block_until_ready(out)

    expected_shape = (N, OUT_CH, H * UP_FACTOR, W * UP_FACTOR)
    assert out.shape == expected_shape, (out.shape, expected_shape)
    assert bool(jnp.all(out >= 0.0)), "ReLU output must be non-negative"

    # Numerical check: both paths accumulate in f32 (reference at HIGHEST
    # precision), so the tolerance is much tighter than before.
    ref = reference_forward(x, params_torch, UP_FACTOR)
    max_err = float(jnp.max(jnp.abs(out - ref)))
    assert max_err < 2e-3, f"mismatch vs reference: max abs err = {max_err}"

    print("KERNEL_OK")
</pallas_src>

<mosaic_0001>
module attributes {stable_mosaic.version = 11 : i64} {
  func.func @kernel(%arg0: i32, %arg1: memref<1x128x16xf32, #tpu.memory_space<vmem>>, %arg2: memref<16x72xf32, #tpu.memory_space<vmem>>, %arg3: memref<1x1152xf32, #tpu.memory_space<vmem>>, %arg4: memref<18x8x8xf32, #tpu.memory_space<vmem>>, %arg5: memref<2x8x1xf32, #tpu.memory_space<vmem>>, %arg6: memref<1x8x1152xf32, #tpu.memory_space<vmem>>, %arg7: memref<8x1408xf32, #tpu.memory_space<vmem>>) attributes {dimension_semantics = [#tpu.dimension_semantics<parallel>], iteration_bounds = array<i64: 2>, scalar_prefetch = 0 : i64, scratch_operands = 1 : i64, tpu.core_type = #tpu.core_type<tc>, window_params = [{transform_indices = @transform_0, window_bounds = array<i64: 1, 128, 16>}, {pipeline_mode = #tpu.pipeline_mode<synchronous>, transform_indices = @transform_1, window_bounds = array<i64: 16, 72>}, {pipeline_mode = #tpu.pipeline_mode<synchronous>, transform_indices = @transform_2, window_bounds = array<i64: 1, 1152>}, {pipeline_mode = #tpu.pipeline_mode<synchronous>, transform_indices = @transform_3, window_bounds = array<i64: 18, 8, 8>}, {pipeline_mode = #tpu.pipeline_mode<synchronous>, transform_indices = @transform_4, window_bounds = array<i64: 2, 8, 1>}, {transform_indices = @transform_5, window_bounds = array<i64: 1, 8, 1152>}]} {
    %cst = arith.constant 0.000000e+00 : f32
    %0 = vector.broadcast %cst : f32 to vector<8x1408xf32>
    %c0 = arith.constant 0 : index
    %c0_0 = arith.constant 0 : index
    %1 = vector.load %arg7[%c0, %c0_0] : memref<8x1408xf32, #tpu.memory_space<vmem>>, vector<8x1408xf32>
    tpu.vector_store %arg7[%c0, %c0_0], %0 {strides = array<i32>} : memref<8x1408xf32, #tpu.memory_space<vmem>>, vector<8x1408xf32>,
    %c0_1 = arith.constant 0 : index
    %c0_2 = arith.constant 0 : index
    %c0_3 = arith.constant 0 : index
    %2 = vector.load %arg1[%c0_1, %c0_2, %c0_3] : memref<1x128x16xf32, #tpu.memory_space<vmem>>, vector<1x128x16xf32>
    %3 = vector.shape_cast %2 : vector<1x128x16xf32> to vector<128x16xf32>
    %c0_4 = arith.constant 0 : index
    %c0_5 = arith.constant 0 : index
    %4 = vector.load %arg2[%c0_4, %c0_5] : memref<16x72xf32, #tpu.memory_space<vmem>>, vector<16x72xf32>
    %cst_6 = arith.constant dense<0.000000e+00> : vector<128x72xf32>
    %5 = tpu.matmul %3, %4, %cst_6 {dimension_numbers = #tpu.dot_dimension_numbers<[1], [0], [0], [1], [0, 0, 1, 1], [], []>} : vector<128x16xf32>, vector<16x72xf32>, vector<128x72xf32> -> vector<128x72xf32>
    %6 = vector.extract_strided_slice %5 {offsets = [0, 0], sizes = [8, 72], strides = [1, 1]} : vector<128x72xf32> to vector<8x72xf32>
    %c0_7 = arith.constant 0 : index
    %c127 = arith.constant 127 : index
    %7 = vector.load %arg7[%c0_7, %c127] : memref<8x1408xf32, #tpu.memory_space<vmem>>, vector<8x72xf32>
    tpu.vector_store %arg7[%c0_7, %c127], %6 {strides = array<i32>} : memref<8x1408xf32, #tpu.memory_space<vmem>>, vector<8x72xf32>,
    %8 = vector.extract_strided_slice %5 {offsets = [8, 0], sizes = [8, 72], strides = [1, 1]} : vector<128x72xf32> to vector<8x72xf32>
    %c0_8 = arith.constant 0 : index
    %c199 = arith.constant 199 : index
    %9 = vector.load %arg7[%c0_8, %c199] : memref<8x1408xf32, #tpu.memory_space<vmem>>, vector<8x72xf32>
    tpu.vector_store %arg7[%c0_8, %c199], %8 {strides = array<i32>} : memref<8x1408xf32, #tpu.memory_space<vmem>>, vector<8x72xf32>,
    %10 = vector.extract_strided_slice %5 {offsets = [16, 0], sizes = [8, 72], strides = [1, 1]} : vector<128x72xf32> to vector<8x72xf32>
    %c0_9 = arith.constant 0 : index
    %c271 = arith.constant 271 : index
    %11 = vector.load %arg7[%c0_9, %c271] : memref<8x1408xf32, #tpu.memory_space<vmem>>, vector<8x72xf32>
    tpu.vector_store %arg7[%c0_9, %c271], %10 {strides = array<i32>} : memref<8x1408xf32, #tpu.memory_space<vmem>>, vector<8x72xf32>,
    %12 = vector.extract_strided_slice %5 {offsets = [24, 0], sizes = [8, 72], strides = [1, 1]} : vector<128x72xf32> to vector<8x72xf32>
    %c0_10 = arith.constant 0 : index
    %c343 = arith.constant 343 : index
    %13 = vector.load %arg7[%c0_10, %c343] : memref<8x1408xf32, #tpu.memory_space<vmem>>, vector<8x72xf32>
    tpu.vector_store %arg7[%c0_10, %c343], %12 {strides = array<i32>} : memref<8x1408xf32, #tpu.memory_space<vmem>>, vector<8x72xf32>,
    %14 = vector.extract_strided_slice %5 {offsets = [32, 0], sizes = [8, 72], strides = [1, 1]} : vector<128x72xf32> to vector<8x72xf32>
    %c0_11 = arith.constant 0 : index
    %c415 = arith.constant 415 : index
    %15 = vector.load %arg7[%c0_11, %c415] : memref<8x1408xf32, #tpu.memory_space<vmem>>, vector<8x72xf32>
    tpu.vector_store %arg7[%c0_11, %c415], %14 {strides = array<i32>} : memref<8x1408xf32, #tpu.memory_space<vmem>>, vector<8x72xf32>,
    %16 = vector.extract_strided_slice %5 {offsets = [40, 0], sizes = [8, 72], strides = [1, 1]} : vector<128x72xf32> to vector<8x72xf32>
    %c0_12 = arith.constant 0 : index
    %c487 = arith.constant 487 : index
    %17 = vector.load %arg7[%c0_12, %c487] : memref<8x1408xf32, #tpu.memory_space<vmem>>, vector<8x72xf32>
    tpu.vector_store %arg7[%c0_12, %c487], %16 {strides = array<i32>} : memref<8x1408xf32, #tpu.memory_space<vmem>>, vector<8x72xf32>,
    %18 = vector.extract_strided_slice %5 {offsets = [48, 0], sizes = [8, 72], strides = [1, 1]} : vector<128x72xf32> to vector<8x72xf32>
    %c0_13 = arith.constant 0 : index
    %c559 = arith.constant 559 : index
    %19 = vector.load %arg7[%c0_13, %c559] : memref<8x1408xf32, #tpu.memory_space<vmem>>, vector<8x72xf32>
    tpu.vector_store %arg7[%c0_13, %c559], %18 {strides = array<i32>} : memref<8x1408xf32, #tpu.memory_space<vmem>>, vector<8x72xf32>,
    %20 = vector.extract_strided_slice %5 {offsets = [56, 0], sizes = [8, 72], strides = [1, 1]} : vector<128x72xf32> to vector<8x72xf32>
    %c0_14 = arith.constant 0 : index
    %c631 = arith.constant 631 : index
    %21 = vector.load %arg7[%c0_14, %c631] : memref<8x1408xf32, #tpu.memory_space<vmem>>, vector<8x72xf32>
    tpu.vector_store %arg7[%c0_14, %c631], %20 {strides = array<i32>} : memref<8x1408xf32, #tpu.memory_space<vmem>>, vector<8x72xf32>,
    %22 = vector.extract_strided_slice %5 {offsets = [64, 0], sizes = [8, 72], strides = [1, 1]} : vector<128x72xf32> to vector<8x72xf32>
    %c0_15 = arith.constant 0 : index
    %c703 = arith.constant 703 : index
    %23 = vector.load %arg7[%c0_15, %c703] : memref<8x1408xf32, #tpu.memory_space<vmem>>, vector<8x72xf32>
    tpu.vector_store %arg7[%c0_15, %c703], %22 {strides = array<i32>} : memref<8x1408xf32, #tpu.memory_space<vmem>>, vector<8x72xf32>,
    %24 = vector.extract_strided_slice %5 {offsets = [72, 0], sizes = [8, 72], strides = [1, 1]} : vector<128x72xf32> to vector<8x72xf32>
    %c0_16 = arith.constant 0 : index
    %c775 = arith.constant 775 : index
    %25 = vector.load %arg7[%c0_16, %c775] : memref<8x1408xf32, #tpu.memory_space<vmem>>, vector<8x72xf32>
    tpu.vector_store %arg7[%c0_16, %c775], %24 {strides = array<i32>} : memref<8x1408xf32, #tpu.memory_space<vmem>>, vector<8x72xf32>,
    %26 = vector.extract_strided_slice %5 {offsets = [80, 0], sizes = [8, 72], strides = [1, 1]} : vector<128x72xf32> to vector<8x72xf32>
    %c0_17 = arith.constant 0 : index
    %c847 = arith.constant 847 : index
    %27 = vector.load %arg7[%c0_17, %c847] : memref<8x1408xf32, #tpu.memory_space<vmem>>, vector<8x72xf32>
    tpu.vector_store %arg7[%c0_17, %c847], %26 {strides = array<i32>} : memref<8x1408xf32, #tpu.memory_space<vmem>>, vector<8x72xf32>,
    %28 = vector.extract_strided_slice %5 {offsets = [88, 0], sizes = [8, 72], strides = [1, 1]} : vector<128x72xf32> to vector<8x72xf32>
    %c0_18 = arith.constant 0 : index
    %c919 = arith.constant 919 : index
    %29 = vector.load %arg7[%c0_18, %c919] : memref<8x1408xf32, #tpu.memory_space<vmem>>, vector<8x72xf32>
    tpu.vector_store %arg7[%c0_18, %c919], %28 {strides = array<i32>} : memref<8x1408xf32, #tpu.memory_space<vmem>>, vector<8x72xf32>,
    %30 = vector.extract_strided_slice %5 {offsets = [96, 0], sizes = [8, 72], strides = [1, 1]} : vector<128x72xf32> to vector<8x72xf32>
    %c0_19 = arith.constant 0 : index
    %c991 = arith.constant 991 : index
    %31 = vector.load %arg7[%c0_19, %c991] : memref<8x1408xf32, #tpu.memory_space<vmem>>, vector<8x72xf32>
    tpu.vector_store %arg7[%c0_19, %c991], %30 {strides = array<i32>} : memref<8x1408xf32, #tpu.memory_space<vmem>>, vector<8x72xf32>,
    %32 = vector.extract_strided_slice %5 {offsets = [104, 0], sizes = [8, 72], strides = [1, 1]} : vector<128x72xf32> to vector<8x72xf32>
    %c0_20 = arith.constant 0 : index
    %c1063 = arith.constant 1063 : index
    %33 = vector.load %arg7[%c0_20, %c1063] : memref<8x1408xf32, #tpu.memory_space<vmem>>, vector<8x72xf32>
    tpu.vector_store %arg7[%c0_20, %c1063], %32 {strides = array<i32>} : memref<8x1408xf32, #tpu.memory_space<vmem>>, vector<8x72xf32>,
    %34 = vector.extract_strided_slice %5 {offsets = [112, 0], sizes = [8, 72], strides = [1, 1]} : vector<128x72xf32> to vector<8x72xf32>
    %c0_21 = arith.constant 0 : index
    %c1135 = arith.constant 1135 : index
    %35 = vector.load %arg7[%c0_21, %c1135] : memref<8x1408xf32, #tpu.memory_space<vmem>>, vector<8x72xf32>
    tpu.vector_store %arg7[%c0_21, %c1135], %34 {strides = array<i32>} : memref<8x1408xf32, #tpu.memory_space<vmem>>, vector<8x72xf32>,
    %36 = vector.extract_strided_slice %5 {offsets = [120, 0], sizes = [8, 72], strides = [1, 1]} : vector<128x72xf32> to vector<8x72xf32>
    %c0_22 = arith.constant 0 : index
    %c1207 = arith.constant 1207 : index
    %37 = vector.load %arg7[%c0_22, %c1207] : memref<8x1408xf32, #tpu.memory_space<vmem>>, vector<8x72xf32>
    tpu.vector_store %arg7[%c0_22, %c1207], %36 {strides = array<i32>} : memref<8x1408xf32, #tpu.memory_space<vmem>>, vector<8x72xf32>,
    %cst_23 = arith.constant 0.000000e+00 : f32
    %38 = vector.broadcast %cst_23 : f32 to vector<8x1152xf32>
    %c0_24 = arith.constant 0 : index
    %c0_25 = arith.constant 0 : index
    %c0_26 = arith.constant 0 : index
    %39 = vector.load %arg4[%c0_24, %c0_25, %c0_26] : memref<18x8x8xf32, #tpu.memory_space<vmem>>, vector<1x8x8xf32>
    %40 = vector.shape_cast %39 : vector<1x8x8xf32> to vector<8x8xf32>
    %c0_27 = arith.constant 0 : index
    %c91 = arith.constant 91 : index
    %41 = vector.load %arg7[%c0_27, %c91] : memref<8x1408xf32, #tpu.memory_space<vmem>>, vector<8x1152xf32>
    %cst_28 = arith.constant dense<0.000000e+00> : vector<8x1152xf32>
    %42 = tpu.matmul %40, %41, %cst_28 {dimension_numbers = #tpu.dot_dimension_numbers<[1], [0], [0], [1], [0, 0, 1, 1], [], []>} : vector<8x8xf32>, vector<8x1152xf32>, vector<8x1152xf32> -> vector<8x1152xf32>
    %43 = arith.addf %38, %42 : vector<8x1152xf32>
    %c1 = arith.constant 1 : index
    %c0_29 = arith.constant 0 : index
    %c0_30 = arith.constant 0 : index
    %44 = vector.load %arg4[%c1, %c0_29, %c0_30] : memref<18x8x8xf32, #tpu.memory_space<vmem>>, vector<1x8x8xf32>
    %45 = vector.shape_cast %44 : vector<1x8x8xf32> to vector<8x8xf32>
    %c0_31 = arith.constant 0 : index
    %c92 = arith.constant 92 : index
    %46 = vector.load %arg7[%c0_31, %c92] : memref<8x1408xf32, #tpu.memory_space<vmem>>, vector<8x1152xf32>
    %cst_32 = arith.constant dense<0.000000e+00> : vector<8x1152xf32>
    %47 = tpu.matmul %45, %46, %cst_32 {dimension_numbers = #tpu.dot_dimension_numbers<[1], [0], [0], [1], [0, 0, 1, 1], [], []>} : vector<8x8xf32>, vector<8x1152xf32>, vector<8x1152xf32> -> vector<8x1152xf32>
    %48 = arith.addf %43, %47 : vector<8x1152xf32>
    %c2 = arith.constant 2 : index
    %c0_33 = arith.constant 0 : index
    %c0_34 = arith.constant 0 : index
    %49 = vector.load %arg4[%c2, %c0_33, %c0_34] : memref<18x8x8xf32, #tpu.memory_space<vmem>>, vector<1x8x8xf32>
    %50 = vector.shape_cast %49 : vector<1x8x8xf32> to vector<8x8xf32>
    %c0_35 = arith.constant 0 : index
    %c93 = arith.constant 93 : index
    %51 = vector.load %arg7[%c0_35, %c93] : memref<8x1408xf32, #tpu.memory_space<vmem>>, vector<8x1152xf32>
    %cst_36 = arith.constant dense<0.000000e+00> : vector<8x1152xf32>
    %52 = tpu.matmul %50, %51, %cst_36 {dimension_numbers = #tpu.dot_dimension_numbers<[1], [0], [0], [1], [0, 0, 1, 1], [], []>} : vector<8x8xf32>, vector<8x1152xf32>, vector<8x1152xf32> -> vector<8x1152xf32>
    %53 = arith.addf %48, %52 : vector<8x1152xf32>
    %c3 = arith.constant 3 : index
    %c0_37 = arith.constant 0 : index
    %c0_38 = arith.constant 0 : index
    %54 = vector.load %arg4[%c3, %c0_37, %c0_38] : memref<18x8x8xf32, #tpu.memory_space<vmem>>, vector<1x8x8xf32>
    %55 = vector.shape_cast %54 : vector<1x8x8xf32> to vector<8x8xf32>
    %c0_39 = arith.constant 0 : index
    %c127_40 = arith.constant 127 : index
    %56 = vector.load %arg7[%c0_39, %c127_40] : memref<8x1408xf32, #tpu.memory_space<vmem>>, vector<8x1152xf32>
    %cst_41 = arith.constant dense<0.000000e+00> : vector<8x1152xf32>
    %57 = tpu.matmul %55, %56, %cst_41 {dimension_numbers = #tpu.dot_dimension_numbers<[1], [0], [0], [1], [0, 0, 1, 1], [], []>} : vector<8x8xf32>, vector<8x1152xf32>, vector<8x1152xf32> -> vector<8x1152xf32>
    %58 = arith.addf %53, %57 : vector<8x1152xf32>
    %c4 = arith.constant 4 : index
    %c0_42 = arith.constant 0 : index
    %c0_43 = arith.constant 0 : index
    %59 = vector.load %arg4[%c4, %c0_42, %c0_43] : memref<18x8x8xf32, #tpu.memory_space<vmem>>, vector<1x8x8xf32>
    %60 = vector.shape_cast %59 : vector<1x8x8xf32> to vector<8x8xf32>
    %c0_44 = arith.constant 0 : index
    %c128 = arith.constant 128 : index
    %61 = vector.load %arg7[%c0_44, %c128] : memref<8x1408xf32, #tpu.memory_space<vmem>>, vector<8x1152xf32>
    %cst_45 = arith.constant dense<0.000000e+00> : vector<8x1152xf32>
    %62 = tpu.matmul %60, %61, %cst_45 {dimension_numbers = #tpu.dot_dimension_numbers<[1], [0], [0], [1], [0, 0, 1, 1], [], []>} : vector<8x8xf32>, vector<8x1152xf32>, vector<8x1152xf32> -> vector<8x1152xf32>
    %63 = arith.addf %58, %62 : vector<8x1152xf32>
    %c5 = arith.constant 5 : index
    %c0_46 = arith.constant 0 : index
    %c0_47 = arith.constant 0 : index
    %64 = vector.load %arg4[%c5, %c0_46, %c0_47] : memref<18x8x8xf32, #tpu.memory_space<vmem>>, vector<1x8x8xf32>
    %65 = vector.shape_cast %64 : vector<1x8x8xf32> to vector<8x8xf32>
    %c0_48 = arith.constant 0 : index
    %c129 = arith.constant 129 : index
    %66 = vector.load %arg7[%c0_48, %c129] : memref<8x1408xf32, #tpu.memory_space<vmem>>, vector<8x1152xf32>
    %cst_49 = arith.constant dense<0.000000e+00> : vector<8x1152xf32>
    %67 = tpu.matmul %65, %66, %cst_49 {dimension_numbers = #tpu.dot_dimension_numbers<[1], [0], [0], [1], [0, 0, 1, 1], [], []>} : vector<8x8xf32>, vector<8x1152xf32>, vector<8x1152xf32> -> vector<8x1152xf32>
    %68 = arith.addf %63, %67 : vector<8x1152xf32>
    %c6 = arith.constant 6 : index
    %c0_50 = arith.constant 0 : index
    %c0_51 = arith.constant 0 : index
    %69 = vector.load %arg4[%c6, %c0_50, %c0_51] : memref<18x8x8xf32, #tpu.memory_space<vmem>>, vector<1x8x8xf32>
    %70 = vector.shape_cast %69 : vector<1x8x8xf32> to vector<8x8xf32>
    %c0_52 = arith.constant 0 : index
    %c163 = arith.constant 163 : index
    %71 = vector.load %arg7[%c0_52, %c163] : memref<8x1408xf32, #tpu.memory_space<vmem>>, vector<8x1152xf32>
    %cst_53 = arith.constant dense<0.000000e+00> : vector<8x1152xf32>
    %72 = tpu.matmul %70, %71, %cst_53 {dimension_numbers = #tpu.dot_dimension_numbers<[1], [0], [0], [1], [0, 0, 1, 1], [], []>} : vector<8x8xf32>, vector<8x1152xf32>, vector<8x1152xf32> -> vector<8x1152xf32>
    %73 = arith.addf %68, %72 : vector<8x1152xf32>
    %c7 = arith.constant 7 : index
    %c0_54 = arith.constant 0 : index
    %c0_55 = arith.constant 0 : index
    %74 = vector.load %arg4[%c7, %c0_54, %c0_55] : memref<18x8x8xf32, #tpu.memory_space<vmem>>, vector<1x8x8xf32>
    %75 = vector.shape_cast %74 : vector<1x8x8xf32> to vector<8x8xf32>
    %c0_56 = arith.constant 0 : index
    %c164 = arith.constant 164 : index
    %76 = vector.load %arg7[%c0_56, %c164] : memref<8x1408xf32, #tpu.memory_space<vmem>>, vector<8x1152xf32>
    %cst_57 = arith.constant dense<0.000000e+00> : vector<8x1152xf32>
    %77 = tpu.matmul %75, %76, %cst_57 {dimension_numbers = #tpu.dot_dimension_numbers<[1], [0], [0], [1], [0, 0, 1, 1], [], []>} : vector<8x8xf32>, vector<8x1152xf32>, vector<8x1152xf32> -> vector<8x1152xf32>
    %78 = arith.addf %73, %77 : vector<8x1152xf32>
    %c8 = arith.constant 8 : index
    %c0_58 = arith.constant 0 : index
    %c0_59 = arith.constant 0 : index
    %79 = vector.load %arg4[%c8, %c0_58, %c0_59] : memref<18x8x8xf32, #tpu.memory_space<vmem>>, vector<1x8x8xf32>
    %80 = vector.shape_cast %79 : vector<1x8x8xf32> to vector<8x8xf32>
    %c0_60 = arith.constant 0 : index
    %c165 = arith.constant 165 : index
    %81 = vector.load %arg7[%c0_60, %c165] : memref<8x1408xf32, #tpu.memory_space<vmem>>, vector<8x1152xf32>
    %cst_61 = arith.constant dense<0.000000e+00> : vector<8x1152xf32>
    %82 = tpu.matmul %80, %81, %cst_61 {dimension_numbers = #tpu.dot_dimension_numbers<[1], [0], [0], [1], [0, 0, 1, 1], [], []>} : vector<8x8xf32>, vector<8x1152xf32>, vector<8x1152xf32> -> vector<8x1152xf32>
    %83 = arith.addf %78, %82 : vector<8x1152xf32>
    %c0_62 = arith.constant 0 : index
    %c0_63 = arith.constant 0 : index
    %c0_64 = arith.constant 0 : index
    %84 = vector.load %arg5[%c0_62, %c0_63, %c0_64] : memref<2x8x1xf32, #tpu.memory_space<vmem>>, vector<1x8x1xf32>
    %85 = vector.shape_cast %84 : vector<1x8x1xf32> to vector<8x1xf32>
    %86 = vector.broadcast %85 : vector<8x1xf32> to vector<8x1152xf32>
    %87 = arith.addf %83, %86 : vector<8x1152xf32>
    %cst_65 = arith.constant 0.000000e+00 : f32
    %88 = vector.broadcast %cst_65 : f32 to vector<8x1152xf32>
    %89 = arith.maximumf %87, %88 : vector<8x1152xf32>
    %c0_66 = arith.constant 0 : index
    %c0_67 = arith.constant 0 : index
    %90 = vector.load %arg3[%c0_66, %c0_67] : memref<1x1152xf32, #tpu.memory_space<vmem>>, vector<1x1152xf32>
    %91 = vector.broadcast %90 : vector<1x1152xf32> to vector<8x1152xf32>
    %92 = arith.mulf %89, %91 : vector<8x1152xf32>
    %c0_68 = arith.constant 0 : index
    %c128_69 = arith.constant 128 : index
    %93 = vector.load %arg7[%c0_68, %c128_69] : memref<8x1408xf32, #tpu.memory_space<vmem>>, vector<8x1152xf32>
    tpu.vector_store %arg7[%c0_68, %c128_69], %92 {strides = array<i32>} : memref<8x1408xf32, #tpu.memory_space<vmem>>, vector<8x1152xf32>,
    %cst_70 = arith.constant 0.000000e+00 : f32
    %94 = vector.broadcast %cst_70 : f32 to vector<8x1152xf32>
    %c9 = arith.constant 9 : index
    %c0_71 = arith.constant 0 : index
    %c0_72 = arith.constant 0 : index
    %95 = vector.load %arg4[%c9, %c0_71, %c0_72] : memref<18x8x8xf32, #tpu.memory_space<vmem>>, vector<1x8x8xf32>
    %96 = vector.shape_cast %95 : vector<1x8x8xf32> to vector<8x8xf32>
    %c0_73 = arith.constant 0 : index
    %c91_74 = arith.constant 91 : index
    %97 = vector.load %arg7[%c0_73, %c91_74] : memref<8x1408xf32, #tpu.memory_space<vmem>>, vector<8x1152xf32>
    %cst_75 = arith.constant dense<0.000000e+00> : vector<8x1152xf32>
    %98 = tpu.matmul %96, %97, %cst_75 {dimension_numbers = #tpu.dot_dimension_numbers<[1], [0], [0], [1], [0, 0, 1, 1], [], []>} : vector<8x8xf32>, vector<8x1152xf32>, vector<8x1152xf32> -> vector<8x1152xf32>
    %99 = arith.addf %94, %98 : vector<8x1152xf32>
    %c10 = arith.constant 10 : index
    %c0_76 = arith.constant 0 : index
    %c0_77 = arith.constant 0 : index
    %100 = vector.load %arg4[%c10, %c0_76, %c0_77] : memref<18x8x8xf32, #tpu.memory_space<vmem>>, vector<1x8x8xf32>
    %101 = vector.shape_cast %100 : vector<1x8x8xf32> to vector<8x8xf32>
    %c0_78 = arith.constant 0 : index
    %c92_79 = arith.constant 92 : index
    %102 = vector.load %arg7[%c0_78, %c92_79] : memref<8x1408xf32, #tpu.memory_space<vmem>>, vector<8x1152xf32>
    %cst_80 = arith.constant dense<0.000000e+00> : vector<8x1152xf32>
    %103 = tpu.matmul %101, %102, %cst_80 {dimension_numbers = #tpu.dot_dimension_numbers<[1], [0], [0], [1], [0, 0, 1, 1], [], []>} : vector<8x8xf32>, vector<8x1152xf32>, vector<8x1152xf32> -> vector<8x1152xf32>
    %104 = arith.addf %99, %103 : vector<8x1152xf32>
    %c11 = arith.constant 11 : index
    %c0_81 = arith.constant 0 : index
    %c0_82 = arith.constant 0 : index
    %105 = vector.load %arg4[%c11, %c0_81, %c0_82] : memref<18x8x8xf32, #tpu.memory_space<vmem>>, vector<1x8x8xf32>
    %106 = vector.shape_cast %105 : vector<1x8x8xf32> to vector<8x8xf32>
    %c0_83 = arith.constant 0 : index
    %c93_84 = arith.constant 93 : index
    %107 = vector.load %arg7[%c0_83, %c93_84] : memref<8x1408xf32, #tpu.memory_space<vmem>>, vector<8x1152xf32>
    %cst_85 = arith.constant dense<0.000000e+00> : vector<8x1152xf32>
    %108 = tpu.matmul %106, %107, %cst_85 {dimension_numbers = #tpu.dot_dimension_numbers<[1], [0], [0], [1], [0, 0, 1, 1], [], []>} : vector<8x8xf32>, vector<8x1152xf32>, vector<8x1152xf32> -> vector<8x1152xf32>
    %109 = arith.addf %104, %108 : vector<8x1152xf32>
    %c12 = arith.constant 12 : index
    %c0_86 = arith.constant 0 : index
    %c0_87 = arith.constant 0 : index
    %110 = vector.load %arg4[%c12, %c0_86, %c0_87] : memref<18x8x8xf32, #tpu.memory_space<vmem>>, vector<1x8x8xf32>
    %111 = vector.shape_cast %110 : vector<1x8x8xf32> to vector<8x8xf32>
    %c0_88 = arith.constant 0 : index
    %c127_89 = arith.constant 127 : index
    %112 = vector.load %arg7[%c0_88, %c127_89] : memref<8x1408xf32, #tpu.memory_space<vmem>>, vector<8x1152xf32>
    %cst_90 = arith.constant dense<0.000000e+00> : vector<8x1152xf32>
    %113 = tpu.matmul %111, %112, %cst_90 {dimension_numbers = #tpu.dot_dimension_numbers<[1], [0], [0], [1], [0, 0, 1, 1], [], []>} : vector<8x8xf32>, vector<8x1152xf32>, vector<8x1152xf32> -> vector<8x1152xf32>
    %114 = arith.addf %109, %113 : vector<8x1152xf32>
    %c13 = arith.constant 13 : index
    %c0_91 = arith.constant 0 : index
    %c0_92 = arith.constant 0 : index
    %115 = vector.load %arg4[%c13, %c0_91, %c0_92] : memref<18x8x8xf32, #tpu.memory_space<vmem>>, vector<1x8x8xf32>
    %116 = vector.shape_cast %115 : vector<1x8x8xf32> to vector<8x8xf32>
    %c0_93 = arith.constant 0 : index
    %c128_94 = arith.constant 128 : index
    %117 = vector.load %arg7[%c0_93, %c128_94] : memref<8x1408xf32, #tpu.memory_space<vmem>>, vector<8x1152xf32>
    %cst_95 = arith.constant dense<0.000000e+00> : vector<8x1152xf32>
    %118 = tpu.matmul %116, %117, %cst_95 {dimension_numbers = #tpu.dot_dimension_numbers<[1], [0], [0], [1], [0, 0, 1, 1], [], []>} : vector<8x8xf32>, vector<8x1152xf32>, vector<8x1152xf32> -> vector<8x1152xf32>
    %119 = arith.addf %114, %118 : vector<8x1152xf32>
    %c14 = arith.constant 14 : index
    %c0_96 = arith.constant 0 : index
    %c0_97 = arith.constant 0 : index
    %120 = vector.load %arg4[%c14, %c0_96, %c0_97] : memref<18x8x8xf32, #tpu.memory_space<vmem>>, vector<1x8x8xf32>
    %121 = vector.shape_cast %120 : vector<1x8x8xf32> to vector<8x8xf32>
    %c0_98 = arith.constant 0 : index
    %c129_99 = arith.constant 129 : index
    %122 = vector.load %arg7[%c0_98, %c129_99] : memref<8x1408xf32, #tpu.memory_space<vmem>>, vector<8x1152xf32>
    %cst_100 = arith.constant dense<0.000000e+00> : vector<8x1152xf32>
    %123 = tpu.matmul %121, %122, %cst_100 {dimension_numbers = #tpu.dot_dimension_numbers<[1], [0], [0], [1], [0, 0, 1, 1], [], []>} : vector<8x8xf32>, vector<8x1152xf32>, vector<8x1152xf32> -> vector<8x1152xf32>
    %124 = arith.addf %119, %123 : vector<8x1152xf32>
    %c15 = arith.constant 15 : index
    %c0_101 = arith.constant 0 : index
    %c0_102 = arith.constant 0 : index
    %125 = vector.load %arg4[%c15, %c0_101, %c0_102] : memref<18x8x8xf32, #tpu.memory_space<vmem>>, vector<1x8x8xf32>
    %126 = vector.shape_cast %125 : vector<1x8x8xf32> to vector<8x8xf32>
    %c0_103 = arith.constant 0 : index
    %c163_104 = arith.constant 163 : index
    %127 = vector.load %arg7[%c0_103, %c163_104] : memref<8x1408xf32, #tpu.memory_space<vmem>>, vector<8x1152xf32>
    %cst_105 = arith.constant dense<0.000000e+00> : vector<8x1152xf32>
    %128 = tpu.matmul %126, %127, %cst_105 {dimension_numbers = #tpu.dot_dimension_numbers<[1], [0], [0], [1], [0, 0, 1, 1], [], []>} : vector<8x8xf32>, vector<8x1152xf32>, vector<8x1152xf32> -> vector<8x1152xf32>
    %129 = arith.addf %124, %128 : vector<8x1152xf32>
    %c16 = arith.constant 16 : index
    %c0_106 = arith.constant 0 : index
    %c0_107 = arith.constant 0 : index
    %130 = vector.load %arg4[%c16, %c0_106, %c0_107] : memref<18x8x8xf32, #tpu.memory_space<vmem>>, vector<1x8x8xf32>
    %131 = vector.shape_cast %130 : vector<1x8x8xf32> to vector<8x8xf32>
    %c0_108 = arith.constant 0 : index
    %c164_109 = arith.constant 164 : index
    %132 = vector.load %arg7[%c0_108, %c164_109] : memref<8x1408xf32, #tpu.memory_space<vmem>>, vector<8x1152xf32>
    %cst_110 = arith.constant dense<0.000000e+00> : vector<8x1152xf32>
    %133 = tpu.matmul %131, %132, %cst_110 {dimension_numbers = #tpu.dot_dimension_numbers<[1], [0], [0], [1], [0, 0, 1, 1], [], []>} : vector<8x8xf32>, vector<8x1152xf32>, vector<8x1152xf32> -> vector<8x1152xf32>
    %134 = arith.addf %129, %133 : vector<8x1152xf32>
    %c17 = arith.constant 17 : index
    %c0_111 = arith.constant 0 : index
    %c0_112 = arith.constant 0 : index
    %135 = vector.load %arg4[%c17, %c0_111, %c0_112] : memref<18x8x8xf32, #tpu.memory_space<vmem>>, vector<1x8x8xf32>
    %136 = vector.shape_cast %135 : vector<1x8x8xf32> to vector<8x8xf32>
    %c0_113 = arith.constant 0 : index
    %c165_114 = arith.constant 165 : index
    %137 = vector.load %arg7[%c0_113, %c165_114] : memref<8x1408xf32, #tpu.memory_space<vmem>>, vector<8x1152xf32>
    %cst_115 = arith.constant dense<0.000000e+00> : vector<8x1152xf32>
    %138 = tpu.matmul %136, %137, %cst_115 {dimension_numbers = #tpu.dot_dimension_numbers<[1], [0], [0], [1], [0, 0, 1, 1], [], []>} : vector<8x8xf32>, vector<8x1152xf32>, vector<8x1152xf32> -> vector<8x1152xf32>
    %139 = arith.addf %134, %138 : vector<8x1152xf32>
    %c1_116 = arith.constant 1 : index
    %c0_117 = arith.constant 0 : index
    %c0_118 = arith.constant 0 : index
    %140 = vector.load %arg5[%c1_116, %c0_117, %c0_118] : memref<2x8x1xf32, #tpu.memory_space<vmem>>, vector<1x8x1xf32>
    %141 = vector.shape_cast %140 : vector<1x8x1xf32> to vector<8x1xf32>
    %142 = vector.broadcast %141 : vector<8x1xf32> to vector<8x1152xf32>
    %143 = arith.addf %139, %142 : vector<8x1152xf32>
    %cst_119 = arith.constant 0.000000e+00 : f32
    %144 = vector.broadcast %cst_119 : f32 to vector<8x1152xf32>
    %145 = arith.maximumf %143, %144 : vector<8x1152xf32>
    %c0_120 = arith.constant 0 : index
    %c0_121 = arith.constant 0 : index
    %c0_122 = arith.constant 0 : index
    %146 = vector.load %arg6[%c0_120, %c0_121, %c0_122] : memref<1x8x1152xf32, #tpu.memory_space<vmem>>, vector<1x8x1152xf32>
    %147 = vector.shape_cast %146 : vector<1x8x1152xf32> to vector<8x1152xf32>
    %148 = vector.shape_cast %145 : vector<8x1152xf32> to vector<1x8x1152xf32>
    tpu.vector_store %arg6[%c0_120, %c0_121, %c0_122], %148 {strides = array<i32>} : memref<1x8x1152xf32, #tpu.memory_space<vmem>>, vector<1x8x1152xf32>,
    return
  }
  func.func @transform_0(%arg0: i32) -> (i32, i32, i32) {
    %c0_i32 = arith.constant 0 : i32
    %c0_i32_0 = arith.constant 0 : i32
    %c0_i32_1 = arith.constant 0 : i32
    return %arg0, %c0_i32, %c0_i32_0 : i32, i32, i32
  }
  func.func @transform_1(%arg0: i32) -> (i32, i32) {
    %c0_i32 = arith.constant 0 : i32
    %c0_i32_0 = arith.constant 0 : i32
    %c0_i32_1 = arith.constant 0 : i32
    return %c0_i32, %c0_i32_0 : i32, i32
  }
  func.func @transform_2(%arg0: i32) -> (i32, i32) {
    %c0_i32 = arith.constant 0 : i32
    %c0_i32_0 = arith.constant 0 : i32
    %c0_i32_1 = arith.constant 0 : i32
    return %c0_i32, %c0_i32_0 : i32, i32
  }
  func.func @transform_3(%arg0: i32) -> (i32, i32, i32) {
    %c0_i32 = arith.constant 0 : i32
    %c0_i32_0 = arith.constant 0 : i32
    %c0_i32_1 = arith.constant 0 : i32
    %c0_i32_2 = arith.constant 0 : i32
    return %c0_i32, %c0_i32_0, %c0_i32_1 : i32, i32, i32
  }
  func.func @transform_4(%arg0: i32) -> (i32, i32, i32) {
    %c0_i32 = arith.constant 0 : i32
    %c0_i32_0 = arith.constant 0 : i32
    %c0_i32_1 = arith.constant 0 : i32
    %c0_i32_2 = arith.constant 0 : i32
    return %c0_i32, %c0_i32_0, %c0_i32_1 : i32, i32, i32
  }
  func.func @transform_5(%arg0: i32) -> (i32, i32, i32) {
    %c0_i32 = arith.constant 0 : i32
    %c0_i32_0 = arith.constant 0 : i32
    %c0_i32_1 = arith.constant 0 : i32
    return %arg0, %c0_i32, %c0_i32_0 : i32, i32, i32
  }
}

</mosaic_0001>

<bundles_post_ra>
// kernel: up_factor_block_forward.1
= control target key start
LH: loop header
LB: loop body
LE: loop exit
PB: predicated region body
PF: predicated region fallthrough
CT: control target
= control target key end

     0   :  { %s8571_s18 = smov 0   ;;  %s9571_s0 = inlined_call_operand.vmem [shape: f32[2,128,16], index: 0, kind: input, shape index: {}]   ;;  %s9572_s1 = inlined_call_operand.vmem [shape: f32[16,72], index: 1, kind: input, shape index: {}]   ;;  %s9573_s2 = inlined_call_operand.vmem [shape: f32[1,1152], index: 2, kind: input, shape index: {}]   ;;  %s9574_s3 = inlined_call_operand.vmem [shape: f32[18,8,8], index: 3, kind: input, shape index: {}]   ;;  %s9575_s4 = inlined_call_operand.vmem [shape: f32[2,8,1], index: 4, kind: input, shape index: {}]   ;;  %s9576_s5 = inlined_call_operand.vmem [shape: f32[2,8,1152], index: 5, kind: output, shape index: {}]  }
   0x1 LB: > { %s8026_s19 = sadd.s32 4294967295, %s8513_s18   ;;  %p8030_p0 = scmp.ge.s32.totalorder %s8513_s18, 1  ;;  %s8513_s18 = sphi %s8571_s18, %s15_s18  }
   0x2   : > { %p187_p1 = scmp.lt.s32.totalorder %s8513_s18, 3 }
   0x4   : > { %p188_p2 = pnand %p8030_p0, %p187_p1 }
   0x5   : > { %v252_v0 = vld [vmem:[%s9572_s1] sm:$0xff] (!%p188_p2)  ;;  %v253_v1 = vld [vmem:[%s9572_s1 + $0x8] sm:$0xff] (!%p188_p2)  ;;  %p215_p3 = scmp.lt.s32.totalorder (!%p188_p2), %s8026_s19, 1  ;;  %vm254_vm0 = vcmask (!%p188_p2), 130048   ;;  %v8515_v19 = vmov (!%p188_p2), 0.0   ;;  %s8516_s28 = smov (!%p188_p2), 87  }
   0x6   : > { %191 = sbr.rel (%p188_p2) target bundleno = 1338 (0x53a), region = 40  ;;  %v8334_v2 = vpack.c.bf16 (!%p188_p2), %v253_v1, %v252_v0  ;;  %228 = vst [vmem:[#allocation2 + $0x18] sm:$0xff] (!%p188_p2), %v8515_v19  ;;  %225 = vst [vmem:[#allocation2] sm:$0xff] (!%p188_p2), %v8515_v19  ;;  %s8517_s29 = smov (!%p188_p2), 71   ;;  %vm476_vm1 = vcmask (!%p188_p2), 252928   ;;  %vm462_vm2 = vcmask (!%p188_p2), 121856  }
   0x7   : > { %226 = vst [vmem:[#allocation2 + $0x8] sm:$0xff] (!%p188_p2), %v8515_v19  ;;  %227 = vst [vmem:[#allocation2 + $0x10] sm:$0xff] (!%p188_p2), %v8515_v19  ;;  %s8518_s30 = smov (!%p188_p2), 15   ;;  %s8519_s6 = smov (!%p188_p2), 127   ;;  %vm468_vm3 = vcmask (!%p188_p2), 711800   ;;  %vm452_vm4 = vcmask (!%p188_p2), 1048568  }
   0x8   : > { %8335 = vmatprep.subr.bf16.mxu0 (!%p188_p2), %v8334_v2  ;;  %8338 = vmatprep.subr.bf16.mxu1 (!%p188_p2), %v8334_v2  ;;  %229 = vst [vmem:[#allocation2 + $0x20] sm:$0xff] (!%p188_p2), %v8515_v19  ;;  %230 = vst [vmem:[#allocation2 + $0x28] sm:$0xff] (!%p188_p2), %v8515_v19  ;;  %s8520_s7 = smov (!%p188_p2), 103   ;;  %s8521_s8 = smov (!%p188_p2), 31   ;;  %vm454_vm5 = vcmask (!%p188_p2), 580608   ;;  %vm474_vm6 = vcmask (!%p188_p2), 1048248  }
   0x9   : > { %8337 = vmatpush3.bf16.msra.mxu0 (!%p188_p2), %v8334_v2  ;;  %8339 = vmatpush3.bf16.msra.mxu1 (!%p188_p2), %v8334_v2  ;;  %231 = vst [vmem:[#allocation2 + $0x30] sm:$0xff] (!%p188_p2), %v8515_v19  ;;  %232 = vst [vmem:[#allocation2 + $0x38] sm:$0xff] (!%p188_p2), %v8515_v19  ;;  %s8522_s9 = smov (!%p188_p2), 47   ;;  %s8523_s10 = smov (!%p188_p2), 119   ;;  %vm460_vm7 = vcmask (!%p188_p2), 1048120   ;;  %vm490_vm8 = vcmask (!%p188_p2), 384000  }
   0xa   : > { %233 = vst [vmem:[#allocation2 + $0x40] sm:$0xff] (!%p188_p2), %v8515_v19  ;;  %234 = vst [vmem:[#allocation2 + $0x48] sm:$0xff] (!%p188_p2), %v8515_v19  ;;  %8249 = vmatprep.subr.mxu0 (!%p188_p2), %v8515_v19  ;;  %s8524_s11 = smov (!%p188_p2), 63   ;;  %s8525_s12 = smov (!%p188_p2), 7   ;;  %vm482_vm9 = vcmask (!%p188_p2), 843000   ;;  %vm488_vm10 = vcmask (!%p188_p2), 1048376  }
   0xb   : > { %235 = vst [vmem:[#allocation2 + $0x50] sm:$0xff] (!%p188_p2), %v8515_v19  ;;  %s8526_s13 = smov (!%p188_p2), 23   ;;  %s8527_s14 = smov (!%p188_p2), 95   ;;  %vm496_vm11 = vcmask (!%p188_p2), 974200   ;;  %vm504_vm12 = vcmask (!%p188_p2), 515072   ;;  %vm502_vm13 = vcmask (!%p188_p2), 1048504  }
   0xc   : > { %s8528_s15 = smov (!%p188_p2), 79   ;;  %s8529_s16 = smov (!%p188_p2), 39   ;;  %vm510_vm14 = vcmask (!%p188_p2), 1048056   ;;  %vm512_vm15 = vcmask (!%p188_p2), 56320   ;;  %v8535_v62 = vmov (!%p188_p2), 0  }
   0xd   : > { %s9578_s19 = smov (!%p215_p3, %s8026_s19), 1  ;;  %s8530_s17 = smov 111   ;;  %8503 = vset.pattern.permute.xlu0 %v8535_v62 }
   0xe   : > { %s8161_s24 = sshll.u32 %s9578_s19, 7  ;;  %s8531_s20 = smov 55  }
   0xf   : > { %s8591_s27 = scalar_lea.vmem %s9571_s0, %s8161_s24  ;;  %s8532_s21 = smov 36  }
  0x10   : > { %v236_v3 = vld [vmem:[%s8591_s27] sm:$0xff]  ;;  %v238_v4 = vld [vmem:[%s8591_s27 + $0x10] sm:$0xff]  ;;  %v237_v5 = vld [vmem:[%s8591_s27 + $0x8] sm:$0xff]  ;;  %s8533_s22 = smov 37   ;;  %s8536_s23 = smov 35  }
  0x11   : > { %8220 = vmatprep.mubr.msk.f32.mxu0 %vm254_vm0, %v236_v3  ;;  %8223 = vmatprep.mubr.msk.f32.mxu1 %vm254_vm0, %v238_v4  ;;  %v239_v6 = vld [vmem:[%s8591_s27 + $0x18] sm:$0xff]  ;;  %v240_v7 = vld [vmem:[%s8591_s27 + $0x20] sm:$0xff]  ;;  %v241_v8 = vld [vmem:[%s8591_s27 + $0x28] sm:$0xff]  ;;  %s8537_s24 = smov 1   ;;  %s8538_s25 = smov 93  }
  0x12   : > { %8221 = vmatmul.mubr.msk.f32.vlgmr.msra.gmra.mrb[0].mxu0 %vm254_vm0, %v237_v5  ;;  %8224 = vmatmul.mubr.msk.f32.vlgmr.msra.gmra.mrb[0].mxu1 %vm254_vm0, %v239_v6  ;;  %v242_v9 = vld [vmem:[%s8591_s27 + $0x30] sm:$0xff]  ;;  %v243_v10 = vld [vmem:[%s8591_s27 + $0x38] sm:$0xff]  ;;  %v244_v11 = vld [vmem:[%s8591_s27 + $0x40] sm:$0xff]  ;;  %s8539_s26 = smov 92  }
  0x13   : > { %8226 = vmatprep.mubr.msk.f32.mxu1 %vm254_vm0, %v240_v7  ;;  %v245_v12 = vld [vmem:[%s8591_s27 + $0x48] sm:$0xff]  ;;  %v246_v13 = vld [vmem:[%s8591_s27 + $0x50] sm:$0xff]  ;;  %v247_v14 = vld [vmem:[%s8591_s27 + $0x58] sm:$0xff] }
  0x14   : > { %v248_v15 = vld [vmem:[%s8591_s27 + $0x60] sm:$0xff]  ;;  %v249_v16 = vld [vmem:[%s8591_s27 + $0x68] sm:$0xff]  ;;  %v250_v17 = vld [vmem:[%s8591_s27 + $0x70] sm:$0xff] }
  0x15   : > { %v251_v18 = vld [vmem:[%s8591_s27 + $0x78] sm:$0xff]  ;;  %v8050_v5 = vld [vmem:[%s9574_s3 + $0x8] sm:$0xff] }
  0x16   : > { %8227 = vmatmul.mubr.msk.f32.gmra.mrb[2].mxu1 %vm254_vm0, %v241_v8 }
  0x17   : > { %8229 = vmatprep.mubr.msk.f32.mxu1 %vm254_vm0, %v242_v9 }
  0x1a   : > { %8230 = vmatmul.mubr.msk.f32.gmra.mrb[4].mxu1 %vm254_vm0, %v243_v10 }
  0x1b   : > { %8232 = vmatprep.mubr.msk.f32.mxu1 %vm254_vm0, %v244_v11 }
  0x1e   : > { %8233 = vmatmul.mubr.msk.f32.gmra.mrb[6].mxu1 %vm254_vm0, %v245_v12 }
  0x1f   : > { %8235 = vmatprep.mubr.msk.f32.mxu1 %vm254_vm0, %v246_v13 }
  0x22   : > { %8236 = vmatmul.mubr.msk.f32.gmra.mrb[8].mxu1 %vm254_vm0, %v247_v14 }
  0x23   : > { %8238 = vmatprep.mubr.msk.f32.mxu1 %vm254_vm0, %v248_v15 }
  0x26   : > { %8239 = vmatmul.mubr.msk.f32.gmra.mrb[10].mxu1 %vm254_vm0, %v249_v16 }
  0x27   : > { %8241 = vmatprep.mubr.msk.f32.mxu1 %vm254_vm0, %v250_v17 }
  0x2a   : > { %8242 = vmatmul.mubr.msk.f32.gmra.mrb[12].mxu1 %vm254_vm0, %v251_v18  ;;  %vm518_vm0 = vcmask 646200  }
  0x2b   : > { %692 = vmatprep.mubr.f32.mxu1 %v8515_v19 }
  0xe5   : > { %v8222_v20 = vpop.f32.mrb[0].mxu0  ;;  %v8225_v21 = vpop.f32.mrb[0].mxu1 }
  0xe6   : > { %471 = vrot.lane.b32.xlu1 %v8225_v21, %s8516_s28  ;;  %457 = vrot.lane.b32.xlu0 %v8222_v20, %s8517_s29  ;;  %v369_v22 = vpop.f32.mrb[1].mxu0  ;;  %v379_v23 = vpop.f32.mrb[1].mxu1  ;;  %s8540_s29 = smov 91  }
  0xe9   : > { %v8228_v24 = vpop.f32.mrb[2].mxu1 }
  0xea   : > { %465 = vrot.lane.b32.xlu1 %v379_v23, %s8518_s30  ;;  %449 = vrot.lane.b32.xlu0 %v369_v22, %s8519_s6  ;;  %v389_v25 = vpop.f32.mrb[3].mxu1 }
  0xed   : > { %v8231_v26 = vpop.f32.mrb[4].mxu1 }
  0xee   : > { %485 = vrot.lane.b32.xlu0 %v8228_v24, %s8520_s7  ;;  %479 = vrot.lane.b32.xlu1 %v389_v25, %s8521_s8  ;;  %v399_v27 = vpop.f32.mrb[5].mxu1 }
  0xf1   : > { %v8234_v28 = vpop.f32.mrb[6].mxu1 }
  0xf2   : > { %493 = vrot.lane.b32.xlu0 %v399_v27, %s8522_s9  ;;  %499 = vrot.lane.b32.xlu1 %v8231_v26, %s8523_s10  ;;  %v409_v29 = vpop.f32.mrb[7].mxu1  ;;  %s8468_s10 = smul.u32 72, %s9578_s19 }
  0xf5   : > { %v8237_v30 = vpop.f32.mrb[8].mxu1 }
  0xf6   : > { %507 = vrot.lane.b32.xlu0 %v409_v29, %s8524_s11  ;;  %515 = vrot.lane.b32.xlu1 %v8234_v28, %s8525_s12  ;;  %v419_v31 = vpop.f32.mrb[9].mxu1  ;;  %v8839_v29 = vld [vmem:[%s9574_s3] sm:$0xff] }
  0xf9   : > { %v8240_v32 = vpop.f32.mrb[10].mxu1 }
  0xfa   : > { %529 = vrot.lane.b32.xlu0 %v8237_v30, %s8526_s13  ;;  %v429_v33 = vpop.f32.mrb[11].mxu1 }
  0xfb   : > { %535 = vrot.lane.b32.xlu1 %v429_v33, %s8527_s14 }
  0xfd   : > { %v8243_v34 = vpop.f32.mrb[12].mxu1 }
  0xfe   : > { %521 = vrot.lane.b32.xlu0 %v419_v31, %s8528_s15  ;;  %v439_v35 = vpop.f32.mrb[13].mxu1 }
  0xff   : > { %543 = vrot.lane.b32.xlu1 %v8240_v32, %s8529_s16 }
 0x102   : > { %549 = vrot.lane.b32.xlu0 %v439_v35, %s8530_s17 }
 0x103   : > { %557 = vrot.lane.b32.xlu1 %v8243_v34, %s8531_s20 }
 0x158   : > { %v472_v36 = vpop.permute.xlu1 %471  ;;  %v458_v37 = vpop.permute.xlu0 %457 }
 0x159   : > { %477 = vst.msk [vmem:[#allocation2 + $0x18] sm:$0xff] %vm476_vm1, %v472_v36  ;;  %vm540_vm1 = vcmask 318464  }
 0x15a   : > { %463 = vst.msk [vmem:[#allocation2 + $0x10] sm:$0xff] %vm462_vm2, %v458_v37  ;;  %vm524_vm2 = vcmask 1048184  }
 0x15c   : > { %v466_v38 = vpop.permute.xlu1 %465  ;;  %v450_v39 = vpop.permute.xlu0 %449 }
 0x15d   : > { %469 = vst.msk [vmem:[#allocation2 + $0x10] sm:$0xff] %vm468_vm3, %v466_v38  ;;  %vm526_vm3 = vcmask 187392  }
 0x15e   : > { %453 = vst.msk [vmem:[#allocation2] sm:$0xff] %vm452_vm4, %v450_v39  ;;  %vm532_vm4 = vcmask 777400  }
 0x15f   : > { %455 = vst.msk [vmem:[#allocation2 + $0x8] sm:$0xff] %vm454_vm5, %v450_v39  ;;  %vm546_vm5 = vcmask 908600  }
 0x160   : > { %475 = vst.msk [vmem:[#allocation2 + $0x10] sm:$0xff] %vm474_vm6, %v472_v36  ;;  %v486_v40 = vpop.permute.xlu0 %485  ;;  %v480_v41 = vpop.permute.xlu1 %479  ;;  %vm538_vm6 = vcmask 1048312  }
 0x161   : > { %461 = vst.msk [vmem:[#allocation2 + $0x8] sm:$0xff] %vm460_vm7, %v458_v37  ;;  %vm552_vm7 = vcmask 1048440  }
 0x162   : > { %491 = vst.msk [vmem:[#allocation2 + $0x20] sm:$0xff] %vm490_vm8, %v486_v40  ;;  %vm554_vm8 = vcmask 449536  }
 0x163   : > { %483 = vst.msk [vmem:[#allocation2 + $0x18] sm:$0xff] %vm482_vm9, %v480_v41  ;;  %vm560_vm9 = vcmask 1039800  }
 0x164   : > { %489 = vst.msk [vmem:[#allocation2 + $0x18] sm:$0xff] %vm488_vm10, %v486_v40  ;;  %v494_v42 = vpop.permute.xlu0 %493  ;;  %v500_v44 = vpop.permute.xlu1 %499  ;;  %vm8534_vm10 = vmmov 0  }
 0x165   : > { %v8639_v43 = vld [vmem:[#allocation2] sm:$0xff]  ;;  %497 = vst.msk [vmem:[#allocation2 + $0x20] sm:$0xff] %vm496_vm11, %v494_v42  ;;  %8251 = vmatprep.mubr.msk.f32.mxu0 %vm8534_vm10, %v8515_v19  ;;  %vm605_vm11 = vcmask 293888  }
 0x166   : > { %585 = vrot.lane.b32.xlu0 %v8639_v43, %s8532_s21  ;;  %505 = vst.msk [vmem:[#allocation2 + $0x28] sm:$0xff] %vm504_vm12, %v500_v44  ;;  %vm624_vm12 = vcmask 64512  }
 0x167   : > { %v8643_v45 = vld [vmem:[#allocation2 + $0x10] sm:$0xff]  ;;  %503 = vst.msk [vmem:[#allocation2 + $0x20] sm:$0xff] %vm502_vm13, %v500_v44  ;;  %vm1002_vm13 = vcmask 302080   ;;  %v4208_v44 = vld [vmem:[%s9575_s4] sm:$0xff] }
 0x168   : > { %589 = vrot.lane.b32.xlu1 %v8643_v45, %s8532_s21  ;;  %v508_v46 = vpop.permute.xlu0 %507  ;;  %v8647_v47 = vld [vmem:[#allocation2 + $0x8] sm:$0xff]  ;;  %v516_v48 = vpop.permute.xlu1 %515 }
 0x169   : > { %511 = vst.msk [vmem:[#allocation2 + $0x28] sm:$0xff] %vm510_vm14, %v508_v46  ;;  %vm1400_vm14 = vcmask 285696  }
 0x16a   : > { %513 = vst.msk [vmem:[#allocation2 + $0x30] sm:$0xff] %vm512_vm15, %v508_v46  ;;  %587 = vrot.lane.b32.xlu0 %v8647_v47, %s8532_s21  ;;  %vm1807_vm15 = vcmask 7168  }
 0x16b   : > { %519 = vst.msk [vmem:[#allocation2 + $0x30] sm:$0xff] %vm518_vm0, %v516_v48  ;;  %v8655_v50 = vld [vmem:[#allocation2 + $0x18] sm:$0xff]  ;;  %vm2602_vm0 = vcmask 1039360  }
 0x16c   : > { %986 = vrot.lane.b32.xlu1 %v8643_v45, %s8533_s22  ;;  %v530_v49 = vpop.permute.xlu0 %529 }
 0x16d   : > { %v536_v51 = vpop.permute.xlu1 %535 }
 0x16e   : > { %984 = vrot.lane.b32.xlu0 %v8647_v47, %s8533_s22  ;;  %541 = vst.msk [vmem:[#allocation2 + $0x40] sm:$0xff] %vm540_vm1, %v536_v51  ;;  %v8659_v53 = vld [vmem:[#allocation2 + $0x20] sm:$0xff]  ;;  %vm3009_vm1 = vcmask 760832  }
 0x170   : > { %591 = vrot.lane.b32.xlu1 %v8655_v50, %s8532_s21  ;;  %v522_v52 = vpop.permute.xlu0 %521  ;;  %v8661_v54 = vld [vmem:[#allocation2 + $0x28] sm:$0xff] }
 0x171   : > { %525 = vst.msk [vmem:[#allocation2 + $0x30] sm:$0xff] %vm524_vm2, %v522_v52  ;;  %v544_v55 = vpop.permute.xlu1 %543  ;;  %vm3416_vm2 = vcmask 752640  }
 0x172   : > { %527 = vst.msk [vmem:[#allocation2 + $0x38] sm:$0xff] %vm526_vm3, %v522_v52  ;;  %593 = vrot.lane.b32.xlu0 %v8659_v53, %s8532_s21  ;;  %vm3823_vm3 = vcmask 744448  }
 0x173   : > { %533 = vst.msk [vmem:[#allocation2 + $0x38] sm:$0xff] %vm532_vm4, %v530_v49  ;;  %v8884_v49 = vld [vmem:[%s9574_s3 + $0x10] sm:$0xff] }
 0x174   : > { %547 = vst.msk [vmem:[#allocation2 + $0x40] sm:$0xff] %vm546_vm5, %v544_v55  ;;  %595 = vrot.lane.b32.xlu1 %v8661_v54, %s8532_s21  ;;  %v550_v56 = vpop.permute.xlu0 %549 }
 0x175   : > { %539 = vst.msk [vmem:[#allocation2 + $0x38] sm:$0xff] %vm538_vm6, %v536_v51  ;;  %v558_v57 = vpop.permute.xlu1 %557 }
 0x176   : > { %553 = vst.msk [vmem:[#allocation2 + $0x40] sm:$0xff] %vm552_vm7, %v550_v56 }
 0x177   : > { %555 = vst.msk [vmem:[#allocation2 + $0x48] sm:$0xff] %vm554_vm8, %v550_v56 }
 0x178   : > { %561 = vst.msk [vmem:[#allocation2 + $0x48] sm:$0xff] %vm560_vm9, %v558_v57  ;;  %v8669_v58 = vld [vmem:[#allocation2 + $0x30] sm:$0xff] }
 0x179   : > { %597 = vrot.lane.b32.xlu0 %v8669_v58, %s8532_s21 }
 0x17c   : > { %v8673_v59 = vld [vmem:[#allocation2 + $0x38] sm:$0xff] }
 0x17d   : > { %599 = vrot.lane.b32.xlu1 %v8673_v59, %s8532_s21  ;;  %v8677_v60 = vld [vmem:[#allocation2 + $0x40] sm:$0xff] }
 0x17e   : > { %601 = vrot.lane.b32.xlu0 %v8677_v60, %s8532_s21 }
 0x17f   : > { %v8685_v61 = vld [vmem:[#allocation2 + $0x48] sm:$0xff] }
 0x181   : > { %988 = vrot.lane.b32.xlu1 %v8655_v50, %s8533_s22 }
 0x182   : > { %982 = vrot.lane.b32.xlu0 %v8639_v43, %s8533_s22 }
 0x185   : > { %603 = vrot.lane.b32.xlu1 %v8685_v61, %s8532_s21 }
 0x186   : > { %990 = vrot.lane.b32.xlu0 %v8659_v53, %s8533_s22 }
 0x189   : > { %992 = vrot.lane.b32.xlu1 %v8661_v54, %s8533_s22 }
 0x18a   : > { %994 = vrot.lane.b32.xlu0 %v8669_v58, %s8533_s22 }
 0x18d   : > { %996 = vrot.lane.b32.xlu1 %v8673_v59, %s8533_s22 }
 0x18e   : > { %998 = vrot.lane.b32.xlu0 %v8677_v60, %s8533_s22 }
 0x191   : > { %1382 = vrot.lane.b32.xlu1 %v8647_v47, %s8536_s23 }
 0x192   : > { %1384 = vrot.lane.b32.xlu0 %v8643_v45, %s8536_s23 }
 0x195   : > { %1380 = vrot.lane.b32.xlu1 %v8639_v43, %s8536_s23 }
 0x196   : > { %1386 = vrot.lane.b32.xlu0 %v8655_v50, %s8536_s23 }
 0x199   : > { %1388 = vrot.lane.b32.xlu1 %v8659_v53, %s8536_s23 }
 0x19a   : > { %1390 = vrot.lane.b32.xlu0 %v8661_v54, %s8536_s23 }
 0x19d   : > { %1392 = vrot.lane.b32.xlu1 %v8669_v58, %s8536_s23 }
 0x19e   : > { %1394 = vrot.lane.b32.xlu0 %v8673_v59, %s8536_s23 }
 0x1a1   : > { %1396 = vrot.lane.b32.xlu1 %v8677_v60, %s8536_s23 }
 0x1a2   : > { %1789 = vrot.lane.b32.xlu0 %v8647_v47, %s8537_s24 }
 0x1a5   : > { %1791 = vrot.lane.b32.xlu1 %v8643_v45, %s8537_s24 }
 0x1a6   : > { %1787 = vrot.lane.b32.xlu0 %v8639_v43, %s8537_s24 }
 0x1a9   : > { %1793 = vrot.lane.b32.xlu1 %v8655_v50, %s8537_s24 }
 0x1aa   : > { %1795 = vrot.lane.b32.xlu0 %v8659_v53, %s8537_s24 }
 0x1ad   : > { %1797 = vrot.lane.b32.xlu1 %v8661_v54, %s8537_s24 }
 0x1ae   : > { %1799 = vrot.lane.b32.xlu0 %v8669_v58, %s8537_s24 }
 0x1b1   : > { %1801 = vrot.lane.b32.xlu1 %v8673_v59, %s8537_s24 }
 0x1b2   : > { %1803 = vrot.lane.b32.xlu0 %v8677_v60, %s8537_s24 }
 0x1b5   : > { %2584 = vrot.lane.b32.xlu1 %v8643_v45, %s8519_s6 }
 0x1b6   : > { %2586 = vrot.lane.b32.xlu0 %v8655_v50, %s8519_s6 }
 0x1b9   : > { %2582 = vrot.lane.b32.xlu1 %v8647_v47, %s8519_s6 }
 0x1ba   : > { %2588 = vrot.lane.b32.xlu0 %v8659_v53, %s8519_s6 }
 0x1bd   : > { %2590 = vrot.lane.b32.xlu1 %v8661_v54, %s8519_s6 }
 0x1be   : > { %2592 = vrot.lane.b32.xlu0 %v8669_v58, %s8519_s6 }
 0x1c1   : > { %2594 = vrot.lane.b32.xlu1 %v8673_v59, %s8519_s6 }
 0x1c2   : > { %2596 = vrot.lane.b32.xlu0 %v8677_v60, %s8519_s6 }
 0x1c5   : > { %2993 = vrot.lane.b32.xlu1 %v8655_v50, %s8538_s25 }
 0x1c6   : > { %2991 = vrot.lane.b32.xlu0 %v8643_v45, %s8538_s25 }
 0x1c9   : > { %2995 = vrot.lane.b32.xlu1 %v8659_v53, %s8538_s25 }
 0x1ca   : > { %2989 = vrot.lane.b32.xlu0 %v8647_v47, %s8538_s25 }
 0x1cd   : > { %2999 = vrot.lane.b32.xlu1 %v8669_v58, %s8538_s25 }
 0x1ce   : > { %2997 = vrot.lane.b32.xlu0 %v8661_v54, %s8538_s25 }
 0x1d1   : > { %3003 = vrot.lane.b32.xlu1 %v8677_v60, %s8538_s25 }
 0x1d2   : > { %3001 = vrot.lane.b32.xlu0 %v8673_v59, %s8538_s25 }
 0x1d5   : > { %2598 = vrot.lane.b32.xlu1 %v8685_v61, %s8519_s6 }
 0x1d6   : > { %3400 = vrot.lane.b32.xlu0 %v8655_v50, %s8539_s26 }
 0x1d8   : > { %v586_v63 = vpop.permute.xlu0 %585 }
 0x1d9   : > { %3398 = vrot.lane.b32.xlu1 %v8643_v45, %s8539_s26 }
 0x1da   : > { %v590_v0 = vpop.permute.xlu1 %589  ;;  %3402 = vrot.lane.b32.xlu0 %v8659_v53, %s8539_s26 }
 0x1dc   : > { %v588_v1 = vpop.permute.xlu0 %587 }
 0x1dd   : > { %3396 = vrot.lane.b32.xlu1 %v8647_v47, %s8539_s26  ;;  %v607_v3 = vsel %vm605_vm11, %v588_v1, %v590_v0  ;;  %v606_v4 = vsel %vm605_vm11, %v586_v63, %v588_v1 }
 0x1de   : > { %v8777_v2 = vpop.permute.xlu1 %986  ;;  %3408 = vrot.lane.b32.xlu0 %v8673_v59, %s8539_s26  ;;  %628 = vmatprep.subr.mxu1 %v607_v3 }
 0x1df   : > { %629 = vmatpush1.msra.mxu1 %v606_v4 }
 0x1e0   : > { %v985_v6 = vpop.permute.xlu0 %984  ;;  %8051 = vmatmul.mubr.msk.f32.vlgmr.msra.gmra.mrb[14].mxu1 %vm624_vm12, %v8050_v5 }
 0x1e1   : > { %3404 = vrot.lane.b32.xlu1 %v8661_v54, %s8539_s26  ;;  %763 = vmatprep.mubr.f32.mxu1 %v8515_v19  ;;  %v1004_v25 = vsel %vm1002_vm13, %v985_v6, %v8777_v2 }
 0x1e2   : > { %3005 = vrot.lane.b32.xlu0 %v8685_v61, %s8538_s25  ;;  %v592_v7 = vpop.permute.xlu1 %591 }
 0x1e3   : > { %v608_v10 = vsel %vm605_vm11, %v590_v0, %v592_v7 }
 0x1e4   : > { %v594_v8 = vpop.permute.xlu0 %593 }
 0x1e5   : > { %3406 = vrot.lane.b32.xlu1 %v8669_v58, %s8539_s26  ;;  %v609_v9 = vsel %vm605_vm11, %v592_v7, %v594_v8 }
 0x1e6   : > { %3410 = vrot.lane.b32.xlu0 %v8677_v60, %s8539_s26  ;;  %699 = vmatprep.subr.mxu1 %v609_v9  ;;  %v596_v11 = vpop.permute.xlu1 %595 }
 0x1e7   : > { %700 = vmatpush1.msra.mxu1 %v608_v10  ;;  %v610_v15 = vsel %vm605_vm11, %v594_v8, %v596_v11  ;;  %v8915_v8 = vld [vmem:[%s9574_s3 + $0x18] sm:$0xff] }
 0x1e8   : > { %8052 = vmatmul.mubr.msk.f32.vlgmr.msra.gmra.mrb[16].mxu1 %vm624_vm12, %v8050_v5 }
 0x1e9   : > { %3805 = vrot.lane.b32.xlu1 %v8643_v45, %s8540_s29  ;;  %834 = vmatprep.mubr.f32.mxu1 %v8515_v19 }
 0x1ea   : > { %3807 = vrot.lane.b32.xlu0 %v8655_v50, %s8540_s29 }
 0x1eb   : > { %v598_v12 = vpop.permute.xlu0 %597 }
 0x1ec   : > { %v611_v13 = vsel %vm605_vm11, %v596_v11, %v598_v12 }
 0x1ed   : > { %3803 = vrot.lane.b32.xlu1 %v8647_v47, %s8540_s29  ;;  %770 = vmatprep.subr.mxu1 %v611_v13 }
 0x1ee   : > { %1000 = vrot.lane.b32.xlu0 %v8685_v61, %s8533_s22  ;;  %771 = vmatpush1.msra.mxu1 %v610_v15 }
 0x1ef   : > { %v600_v14 = vpop.permute.xlu1 %599  ;;  %8053 = vmatmul.mubr.msk.f32.vlgmr.msra.gmra.mrb[18].mxu1 %vm624_vm12, %v8050_v5 }
 0x1f0   : > { %v602_v16 = vpop.permute.xlu0 %601  ;;  %905 = vmatprep.mubr.f32.mxu1 %v8515_v19  ;;  %v612_v20 = vsel %vm605_vm11, %v598_v12, %v600_v14 }
 0x1f1   : > { %1398 = vrot.lane.b32.xlu1 %v8685_v61, %s8536_s23  ;;  %v613_v17 = vsel %vm605_vm11, %v600_v14, %v602_v16 }
 0x1f2   : > { %3809 = vrot.lane.b32.xlu0 %v8659_v53, %s8540_s29  ;;  %841 = vmatprep.subr.mxu1 %v613_v17 }
 0x1f3   : > { %v989_v18 = vpop.permute.xlu1 %988  ;;  %842 = vmatpush1.msra.mxu1 %v612_v20 }
 0x1f4   : > { %v983_v21 = vpop.permute.xlu0 %982  ;;  %8054 = vmatmul.mubr.msk.f32.vlgmr.msra.gmra.mrb[20].mxu1 %vm624_vm12, %v8050_v5  ;;  %8244 = vmatprep.subr.mxu1 %v8515_v19  ;;  %v1005_v31 = vsel %vm1002_vm13, %v8777_v2, %v989_v18 }
 0x1f5   : > { %3412 = vrot.lane.b32.xlu1 %v8685_v61, %s8539_s26  ;;  %8246 = vmatprep.mubr.msk.f32.mxu1 %vm8534_vm10, %v8515_v19  ;;  %v1003_v26 = vsel %vm1002_vm13, %v983_v21, %v985_v6 }
 0x1f6   : > { %1805 = vrot.lane.b32.xlu0 %v8685_v61, %s8537_s24 }
 0x1f7   : > { %v604_v22 = vpop.permute.xlu1 %603 }
 0x1f8   : > { %v614_v23 = vsel %vm605_vm11, %v602_v16, %v604_v22  ;;  %v991_v24 = vpop.permute.xlu0 %990 }
 0x1f9   : > { %3811 = vrot.lane.b32.xlu1 %v8661_v54, %s8540_s29  ;;  %8245 = vmatpush3.msra.mxu1 %v614_v23  ;;  %v1006_v27 = vsel %vm1002_vm13, %v989_v18, %v991_v24 }
 0x1fa   : > { %8247 = vmatmul.mubr.msk.f32.vlgmr.msra.gmra.mrb[22].mxu1 %vm624_vm12, %v8050_v5  ;;  %1024 = vmatprep.subr.mxu1 %v1004_v25 }
 0x1fb   : > { %v993_v28 = vpop.permute.xlu1 %992  ;;  %2600 = vrot.lane.b32.xlu0 %v8515_v19, %s8519_s6  ;;  %1025 = vmatpush1.msra.mxu1 %v1003_v26 }
 0x1fc   : > { %1095 = vmatprep.subr.mxu1 %v1006_v27  ;;  %1088 = vmatprep.mubr.f32.mxu1 %v8515_v19  ;;  %v995_v30 = vpop.permute.xlu0 %994  ;;  %v1007_v35 = vsel %vm1002_vm13, %v991_v24, %v993_v28  ;;  %v8943_v24 = vld [vmem:[%s9574_s3 + $0x20] sm:$0xff] }
 0x1fd   : > { %3813 = vrot.lane.b32.xlu1 %v8669_v58, %s8540_s29  ;;  %v1008_v32 = vsel %vm1002_vm13, %v993_v28, %v995_v30 }
 0x1fe   : > { %8056 = vmatmul.mubr.msk.f32.vlgmr.msra.gmra.mrb[14].mxu1 %vm624_vm12, %v8839_v29 }
 0x1ff   : > { %1096 = vmatpush1.msra.mxu1 %v1005_v31  ;;  %v997_v33 = vpop.permute.xlu1 %996  ;;  %3815 = vrot.lane.b32.xlu0 %v8673_v59, %s8540_s29 }
 0x200   : > { %1166 = vmatprep.subr.mxu1 %v1008_v32  ;;  %1159 = vmatprep.mubr.f32.mxu1 %v8515_v19  ;;  %v8854_v34 = vpop.permute.xlu0 %998  ;;  %v1009_v39 = vsel %vm1002_vm13, %v995_v30, %v997_v33 }
 0x201   : > { %3007 = vrot.lane.b32.xlu1 %v8515_v19, %s8538_s25  ;;  %v1010_v36 = vsel %vm1002_vm13, %v997_v33, %v8854_v34 }
 0x202   : > { %8057 = vmatmul.mubr.msk.f32.vlgmr.msra.gmra.mrb[16].mxu1 %vm624_vm12, %v8839_v29 }
 0x203   : > { %1167 = vmatpush1.msra.mxu1 %v1007_v35  ;;  %v1383_v37 = vpop.permute.xlu1 %1382  ;;  %3817 = vrot.lane.b32.xlu0 %v8677_v60, %s8540_s29 }
 0x204   : > { %1237 = vmatprep.subr.mxu1 %v1010_v36  ;;  %1230 = vmatprep.mubr.f32.mxu1 %v8515_v19  ;;  %v1385_v38 = vpop.permute.xlu0 %1384 }
 0x205   : > { %3819 = vrot.lane.b32.xlu1 %v8685_v61, %s8540_s29  ;;  %v1402_v40 = vsel %vm1400_vm14, %v1383_v37, %v1385_v38 }
 0x206   : > { %8058 = vmatmul.mubr.msk.f32.vlgmr.msra.gmra.mrb[18].mxu1 %vm624_vm12, %v8839_v29 }
 0x207   : > { %1238 = vmatpush1.msra.mxu1 %v1009_v39  ;;  %v1381_v41 = vpop.permute.xlu1 %1380  ;;  %3414 = vrot.lane.b32.xlu0 %v8515_v19, %s8539_s26 }
 0x208   : > { %v1401_v42 = vsel %vm1400_vm14, %v1381_v41, %v1383_v37  ;;  %1422 = vmatprep.subr.mxu1 %v1402_v40  ;;  %1301 = vmatprep.mubr.f32.mxu1 %v8515_v19  ;;  %v1387_v46 = vpop.permute.xlu0 %1386 }
 0x209   : > { %3821 = vrot.lane.b32.xlu1 %v8515_v19, %s8540_s29  ;;  %v1403_v55 = vsel %vm1400_vm14, %v1385_v38, %v1387_v46 }
 0x20a   : > { %8059 = vmatmul.mubr.msk.f32.vlgmr.msra.gmra.mrb[20].mxu1 %vm624_vm12, %v8839_v29 }
 0x20b   : > { %1423 = vmatpush1.msra.mxu1 %v1401_v42  ;;  %v1389_v48 = vpop.permute.xlu1 %1388  ;;  %4211 = vperm.xlu0 %8503, %v4208_v44  }
 0x20c   : > { %1486 = vmatprep.mubr.f32.mxu1 %v8515_v19  ;;  %v1404_v51 = vsel %vm1400_vm14, %v1387_v46, %v1389_v48  ;;  %v1391_v52 = vpop.permute.xlu0 %1390 }
 0x20d   : > { %1493 = vmatprep.subr.mxu1 %v1404_v51  ;;  %v1405_v63 = vsel %vm1400_vm14, %v1389_v48, %v1391_v52 }
 0x20e   : > { %8062 = vmatmul.mubr.msk.f32.vlgmr.msra.gmra.mrb[14].mxu1 %vm624_vm12, %v8884_v49 }
 0x20f   : > { %1494 = vmatpush1.msra.mxu1 %v1403_v55  ;;  %v1393_v56 = vpop.permute.xlu1 %1392  ;;  %4323 = vrot.lane.b32.xlu0 %v8639_v43, %s8532_s21 }
 0x210   : > { %1557 = vmatprep.mubr.f32.mxu1 %v8515_v19  ;;  %v1406_v57 = vsel %vm1400_vm14, %v1391_v52, %v1393_v56  ;;  %v1395_v62 = vpop.permute.xlu0 %1394  ;;  %v8997_v52 = vld [vmem:[%s9574_s3 + $0x30] sm:$0xff] }
 0x211   : > { %1564 = vmatprep.subr.mxu1 %v1406_v57  ;;  %v1407_v2 = vsel %vm1400_vm14, %v1393_v56, %v1395_v62 }
 0x212   : > { %8063 = vmatmul.mubr.msk.f32.vlgmr.msra.gmra.mrb[16].mxu1 %vm624_vm12, %v8884_v49 }
 0x213   : > { %1565 = vmatpush1.msra.mxu1 %v1405_v63  ;;  %v8898_v0 = vpop.permute.xlu1 %1396  ;;  %1628 = vmatprep.mubr.f32.mxu1 %v8515_v19 }
 0x214   : > { %v1408_v1 = vsel %vm1400_vm14, %v1395_v62, %v8898_v0  ;;  %v1790_v43 = vpop.permute.xlu0 %1789 }
 0x215   : > { %1635 = vmatprep.subr.mxu1 %v1408_v1 }
 0x216   : > { %8064 = vmatmul.mubr.msk.f32.vlgmr.msra.gmra.mrb[18].mxu1 %vm624_vm12, %v8884_v49 }
 0x217   : > { %1636 = vmatpush1.msra.mxu1 %v1407_v2  ;;  %v1792_v3 = vpop.permute.xlu1 %1791  ;;  %1699 = vmatprep.mubr.f32.mxu1 %v8515_v19 }
 0x218   : > { %v1809_v4 = vsel %vm1807_vm15, %v1790_v43, %v1792_v3  ;;  %v1788_v5 = vpop.permute.xlu0 %1787 }
 0x219   : > { %1829 = vmatprep.subr.mxu1 %v1809_v4  ;;  %v1808_v6 = vsel %vm1807_vm15, %v1788_v5, %v1790_v43 }
 0x21a   : > { %8065 = vmatmul.mubr.msk.f32.vlgmr.msra.gmra.mrb[20].mxu1 %vm624_vm12, %v8884_v49 }
 0x21b   : > { %v1794_v7 = vpop.permute.xlu1 %1793  ;;  %1830 = vmatpush1.msra.mxu1 %v1808_v6  ;;  %1893 = vmatprep.mubr.f32.mxu1 %v8515_v19 }
 0x21c   : > { %v1796_v9 = vpop.permute.xlu0 %1795  ;;  %v1810_v12 = vsel %vm1807_vm15, %v1792_v3, %v1794_v7 }
 0x21d   : > { %v1811_v10 = vsel %vm1807_vm15, %v1794_v7, %v1796_v9 }
 0x21e   : > { %8068 = vmatmul.mubr.msk.f32.vlgmr.msra.gmra.mrb[14].mxu1 %vm624_vm12, %v8915_v8  ;;  %1900 = vmatprep.subr.mxu1 %v1811_v10 }
 0x21f   : > { %v1798_v11 = vpop.permute.xlu1 %1797  ;;  %1964 = vmatprep.mubr.f32.mxu1 %v8515_v19  ;;  %1901 = vmatpush1.msra.mxu1 %v1810_v12  ;;  %v9025_v12 = vld [vmem:[%s9574_s3 + $0x38] sm:$0xff] }
 0x220   : > { %v1800_v13 = vpop.permute.xlu0 %1799  ;;  %v1812_v16 = vsel %vm1807_vm15, %v1796_v9, %v1798_v11 }
 0x221   : > { %v1813_v14 = vsel %vm1807_vm15, %v1798_v11, %v1800_v13 }
 0x222   : > { %8069 = vmatmul.mubr.msk.f32.vlgmr.msra.gmra.mrb[16].mxu1 %vm624_vm12, %v8915_v8  ;;  %1971 = vmatprep.subr.mxu1 %v1813_v14 }
 0x223   : > { %v1802_v15 = vpop.permute.xlu1 %1801  ;;  %2035 = vmatprep.mubr.f32.mxu1 %v8515_v19  ;;  %1972 = vmatpush1.msra.mxu1 %v1812_v16 }
 0x224   : > { %v8927_v17 = vpop.permute.xlu0 %1803  ;;  %v1814_v21 = vsel %vm1807_vm15, %v1800_v13, %v1802_v15 }
 0x225   : > { %v1815_v18 = vsel %vm1807_vm15, %v1802_v15, %v8927_v17 }
 0x226   : > { %8070 = vmatmul.mubr.msk.f32.vlgmr.msra.gmra.mrb[18].mxu1 %vm624_vm12, %v8915_v8  ;;  %2042 = vmatprep.subr.mxu1 %v1815_v18 }
 0x227   : > { %v2585_v20 = vpop.permute.xlu1 %2584  ;;  %2106 = vmatprep.mubr.f32.mxu1 %v8515_v19  ;;  %2043 = vmatpush1.msra.mxu1 %v1814_v21 }
 0x228   : > { %2197 = vmatprep.subr.mxu1 %v8643_v45  ;;  %v2587_v22 = vpop.permute.xlu0 %2586 }
 0x22a   : > { %8071 = vmatmul.mubr.msk.f32.vlgmr.msra.gmra.mrb[20].mxu1 %vm624_vm12, %v8915_v8 }
 0x22b   : > { %2198 = vmatpush1.msra.mxu1 %v8647_v47  ;;  %v2583_v23 = vpop.permute.xlu1 %2582  ;;  %2261 = vmatprep.mubr.f32.mxu1 %v8515_v19 }
 0x22c   : > { %2268 = vmatprep.subr.mxu1 %v8659_v53  ;;  %v2589_v25 = vpop.permute.xlu0 %2588 }
 0x22d   : > { %v2605_v31 = vsel %vm2602_vm0, %v2587_v22, %v2589_v25 }
 0x22e   : > { %8074 = vmatmul.mubr.msk.f32.vlgmr.msra.gmra.mrb[14].mxu1 %vm624_vm12, %v8943_v24 }
 0x22f   : > { %2269 = vmatpush1.msra.mxu1 %v8655_v50  ;;  %v2591_v45 = vpop.permute.xlu1 %2590  ;;  %2332 = vmatprep.mubr.f32.mxu1 %v8515_v19 }
 0x230   : > { %2339 = vmatprep.subr.mxu1 %v8669_v58  ;;  %v2593_v47 = vpop.permute.xlu0 %2592  ;;  %v2604_v58 = vsel %vm2602_vm0, %v2585_v20, %v2587_v22  ;;  %v2606_v28 = vsel %vm2602_vm0, %v2589_v25, %v2591_v45 }
 0x231   : > { %v2607_v36 = vsel %vm2602_vm0, %v2591_v45, %v2593_v47 }
 0x232   : > { %8075 = vmatmul.mubr.msk.f32.vlgmr.msra.gmra.mrb[16].mxu1 %vm624_vm12, %v8943_v24 }
 0x233   : > { %2340 = vmatpush1.msra.mxu1 %v8661_v54  ;;  %v2595_v26 = vpop.permute.xlu1 %2594  ;;  %2403 = vmatprep.mubr.f32.mxu1 %v8515_v19  ;;  %v2603_v54 = vsel %vm2602_vm0, %v2583_v23, %v2585_v20 }
 0x234   : > { %2410 = vmatprep.subr.mxu1 %v8677_v60  ;;  %v2597_v53 = vpop.permute.xlu0 %2596  ;;  %v2608_v33 = vsel %vm2602_vm0, %v2593_v47, %v2595_v26 }
 0x235   : > { %v2609_v42 = vsel %vm2602_vm0, %v2595_v26, %v2597_v53 }
 0x236   : > { %8076 = vmatmul.mubr.msk.f32.vlgmr.msra.gmra.mrb[18].mxu1 %vm624_vm12, %v8943_v24 }
 0x237   : > { %2411 = vmatpush1.msra.mxu1 %v8673_v59  ;;  %v2994_v50 = vpop.permute.xlu1 %2993  ;;  %2474 = vmatprep.mubr.f32.mxu1 %v8515_v19  ;;  %v8969_v59 = vld [vmem:[%s9574_s3 + $0x28] sm:$0xff] }
 0x238   : > { %2624 = vmatprep.subr.mxu1 %v2604_v58  ;;  %v2992_v27 = vpop.permute.xlu0 %2991  ;;  %v8097_v58 = vld [vmem:[%s9574_s3 + $0x40] sm:$0xff] }
 0x239   : > { %v3011_v44 = vsel %vm3009_vm1, %v2992_v27, %v2994_v50 }
 0x23a   : > { %8077 = vmatmul.mubr.msk.f32.vlgmr.msra.gmra.mrb[20].mxu1 %vm624_vm12, %v8943_v24 }
 0x23b   : > { %2625 = vmatpush1.msra.mxu1 %v2603_v54  ;;  %v2996_v60 = vpop.permute.xlu1 %2995  ;;  %2688 = vmatprep.mubr.f32.mxu1 %v8515_v19 }
 0x23c   : > { %2695 = vmatprep.subr.mxu1 %v2606_v28  ;;  %v2990_v30 = vpop.permute.xlu0 %2989  ;;  %v3012_v57 = vsel %vm3009_vm1, %v2994_v50, %v2996_v60 }
 0x23d   : > { %v3010_v46 = vsel %vm3009_vm1, %v2990_v30, %v2992_v27 }
 0x23e   : > { %8080 = vmatmul.mubr.msk.f32.vlgmr.msra.gmra.mrb[14].mxu1 %vm624_vm12, %v8969_v59 }
 0x23f   : > { %2696 = vmatpush1.msra.mxu1 %v2605_v31  ;;  %v3000_v32 = vpop.permute.xlu1 %2999  ;;  %2759 = vmatprep.mubr.f32.mxu1 %v8515_v19 }
 0x240   : > { %2766 = vmatprep.subr.mxu1 %v2608_v33  ;;  %v2998_v35 = vpop.permute.xlu0 %2997 }
 0x241   : > { %v3013_v51 = vsel %vm3009_vm1, %v2996_v60, %v2998_v35  ;;  %v3014_v43 = vsel %vm3009_vm1, %v2998_v35, %v3000_v32 }
 0x242   : > { %8081 = vmatmul.mubr.msk.f32.vlgmr.msra.gmra.mrb[16].mxu1 %vm624_vm12, %v8969_v59 }
 0x243   : > { %2767 = vmatpush1.msra.mxu1 %v2607_v36  ;;  %v3004_v37 = vpop.permute.xlu1 %3003  ;;  %2830 = vmatprep.mubr.f32.mxu1 %v8515_v19 }
 0x244   : > { %v3002_v38 = vpop.permute.xlu0 %3001 }
 0x245   : > { %v3015_v62 = vsel %vm3009_vm1, %v3000_v32, %v3002_v38  ;;  %v3016_v5 = vsel %vm3009_vm1, %v3002_v38, %v3004_v37 }
 0x246   : > { %8082 = vmatmul.mubr.msk.f32.vlgmr.msra.gmra.mrb[18].mxu1 %vm624_vm12, %v8969_v59 }
 0x247   : > { %v8982_v39 = vpop.permute.xlu1 %2598  ;;  %2901 = vmatprep.mubr.f32.mxu1 %v8515_v19 }
 0x248   : > { %v2610_v40 = vsel %vm2602_vm0, %v2597_v53, %v8982_v39  ;;  %v3401_v41 = vpop.permute.xlu0 %3400 }
 0x249   : > { %2837 = vmatprep.subr.mxu1 %v2610_v40 }
 0x24a   : > { %2838 = vmatpush1.msra.mxu1 %v2609_v42 }
 0x24b   : > { %v3399_v48 = vpop.permute.xlu1 %3398  ;;  %8083 = vmatmul.mubr.msk.f32.vlgmr.msra.gmra.mrb[20].mxu1 %vm624_vm12, %v8969_v59  ;;  %3031 = vmatprep.subr.mxu1 %v3011_v44 }
 0x24c   : > { %3032 = vmatpush1.msra.mxu1 %v3010_v46  ;;  %3095 = vmatprep.mubr.f32.mxu1 %v8515_v19  ;;  %v3403_v55 = vpop.permute.xlu0 %3402  ;;  %v3418_v6 = vsel %vm3416_vm2, %v3399_v48, %v3401_v41  ;;  %v4236_v46 = vlaneseq }
 0x24d   : > { %3102 = vmatprep.subr.mxu1 %v3013_v51  ;;  %v3419_v15 = vsel %vm3416_vm2, %v3401_v41, %v3403_v55 }
 0x24f   : > { %v3397_v56 = vpop.permute.xlu1 %3396  ;;  %8086 = vmatmul.mubr.msk.f32.vlgmr.msra.gmra.mrb[14].mxu1 %vm624_vm12, %v8997_v52 }
 0x250   : > { %3103 = vmatpush1.msra.mxu1 %v3012_v57  ;;  %3166 = vmatprep.mubr.f32.mxu1 %v8515_v19  ;;  %v3409_v63 = vpop.permute.xlu0 %3408  ;;  %v3417_v9 = vsel %vm3416_vm2, %v3397_v56, %v3399_v48 }
 0x251   : > { %3173 = vmatprep.subr.mxu1 %v3015_v62 }
 0x253   : > { %v3405_v1 = vpop.permute.xlu1 %3404  ;;  %8087 = vmatmul.mubr.msk.f32.vlgmr.msra.gmra.mrb[16].mxu1 %vm624_vm12, %v8997_v52 }
 0x254   : > { %3174 = vmatpush1.msra.mxu1 %v3014_v43  ;;  %3237 = vmatprep.mubr.f32.mxu1 %v8515_v19  ;;  %v9008_v2 = vpop.permute.xlu0 %3005  ;;  %v3420_v11 = vsel %vm3416_vm2, %v3403_v55, %v3405_v1  ;;  %v9121_v55 = vshrl.u32 %v4236_v46, 7 }
 0x255   : > { %v3017_v3 = vsel %vm3009_vm1, %v3004_v37, %v9008_v2 }
 0x256   : > { %3244 = vmatprep.subr.mxu1 %v3017_v3  ;;  %v4242_v43 = vsub.s32 1, %v9121_v55 }
 0x257   : > { %v3407_v4 = vpop.permute.xlu1 %3406  ;;  %8088 = vmatmul.mubr.msk.f32.vlgmr.msra.gmra.mrb[18].mxu1 %vm624_vm12, %v8997_v52 }
 0x258   : > { %3245 = vmatpush1.msra.mxu1 %v3016_v5  ;;  %3308 = vmatprep.mubr.f32.mxu1 %v8515_v19  ;;  %v3411_v7 = vpop.permute.xlu0 %3410  ;;  %v3422_v16 = vsel %vm3416_vm2, %v3407_v4, %v3409_v63  ;;  %v3421_v22 = vsel %vm3416_vm2, %v3405_v1, %v3407_v4  ;;  %v4232_v1 = vld [vmem:[%s9573_s2] sm:$0xff] }
 0x259   : > { %3438 = vmatprep.subr.mxu1 %v3418_v6  ;;  %v3423_v45 = vsel %vm3416_vm2, %v3409_v63, %v3411_v7  ;;  %v4238_v63 = vsub.s32 0, %v9121_v55 }
 0x25b   : > { %v3806_v10 = vpop.permute.xlu1 %3805  ;;  %8089 = vmatmul.mubr.msk.f32.vlgmr.msra.gmra.mrb[20].mxu1 %vm624_vm12, %v8997_v52  ;;  %v4239_v5 = vrot.slane %v4232_v1, %v4238_v63 }
 0x25c   : > { %3439 = vmatpush1.msra.mxu1 %v3417_v9  ;;  %3502 = vmatprep.mubr.f32.mxu1 %v8515_v19  ;;  %v3808_v13 = vpop.permute.xlu0 %3807  ;;  %v4246_v9 = vsub.s32 2, %v9121_v55 }
 0x25d   : > { %3509 = vmatprep.subr.mxu1 %v3420_v11 }
 0x25f   : > { %v3804_v14 = vpop.permute.xlu1 %3803  ;;  %8092 = vmatmul.mubr.msk.f32.vlgmr.msra.gmra.mrb[14].mxu1 %vm624_vm12, %v9025_v12 }
 0x260   : > { %3510 = vmatpush1.msra.mxu1 %v3419_v15  ;;  %3573 = vmatprep.mubr.f32.mxu1 %v8515_v19  ;;  %v1001_v18 = vpop.permute.xlu0 %1000  ;;  %v3824_v53 = vsel %vm3823_vm3, %v3804_v14, %v3806_v10  ;;  %v4250_v14 = vsub.s32 3, %v9121_v55 }
 0x261   : > { %3580 = vmatprep.subr.mxu1 %v3422_v16  ;;  %v1011_v20 = vsel %vm1002_vm13, %v8854_v34, %v1001_v18 }
 0x262   : > { %8250 = vmatpush3.msra.mxu0 %v1011_v20  ;;  %v4254_v20 = vsub.s32 4, %v9121_v55 }
 0x263   : > { %v1399_v21 = vpop.permute.xlu1 %1398  ;;  %8093 = vmatmul.mubr.msk.f32.vlgmr.msra.gmra.mrb[16].mxu1 %vm624_vm12, %v9025_v12  ;;  %8252 = vmatmul.mubr.msk.f32.vlgmr.msra.gmra.mrb[2].mxu0 %vm624_vm12, %v8839_v29 }
 0x264   : > { %v1409_v23 = vsel %vm1400_vm14, %v8898_v0, %v1399_v21  ;;  %3581 = vmatpush1.msra.mxu1 %v3421_v22  ;;  %8254 = vmatprep.subr.mxu0 %v8515_v19  ;;  %v3810_v25 = vpop.permute.xlu0 %3809 }
 0x265   : > { %3644 = vmatprep.mubr.f32.mxu1 %v8515_v19  ;;  %8255 = vmatpush3.msra.mxu0 %v1409_v23  ;;  %v3826_v54 = vsel %vm3823_vm3, %v3808_v13, %v3810_v25  ;;  %v4247_v23 = vrot.slane %v4232_v1, %v4246_v9 }
 0x266   : > { %8256 = vmatprep.mubr.msk.f32.mxu0 %vm8534_vm10, %v8515_v19  ;;  %8259 = vmatprep.subr.mxu0 %v8515_v19 }
 0x267   : > { %v9045_v34 = vpop.permute.xlu1 %3412  ;;  %8094 = vmatmul.mubr.msk.f32.vlgmr.msra.gmra.mrb[18].mxu1 %vm624_vm12, %v9025_v12  ;;  %8257 = vmatmul.mubr.msk.f32.vlgmr.msra.gmra.mrb[4].mxu0 %vm624_vm12, %v8884_v49  ;;  %v3825_v49 = vsel %vm3823_vm3, %v3806_v10, %v3808_v13 }
 0x268   : > { %v3424_v29 = vsel %vm3416_vm2, %v3411_v7, %v9045_v34  ;;  %3715 = vmatprep.mubr.f32.mxu1 %v8515_v19  ;;  %v1806_v0 = vpop.permute.xlu0 %1805  ;;  %8261 = vmatprep.mubr.msk.f32.mxu0 %vm8534_vm10, %v8515_v19  ;;  %v9067_v19 = vld [vmem:[#allocation2 + $0x50] sm:$0xff] }
 0x269   : > { %3651 = vmatprep.subr.mxu1 %v3424_v29  ;;  %v1816_v47 = vsel %vm1807_vm15, %v8927_v17, %v1806_v0  ;;  %v4258_v29 = vsub.s32 5, %v9121_v55 }
 0x26a   : > { %3652 = vmatpush1.msra.mxu1 %v3423_v45  ;;  %8260 = vmatpush3.msra.mxu0 %v1816_v47 }
 0x26b   : > { %v3812_v26 = vpop.permute.xlu1 %3811  ;;  %8095 = vmatmul.mubr.msk.f32.vlgmr.msra.gmra.mrb[20].mxu1 %vm624_vm12, %v9025_v12  ;;  %3845 = vmatprep.subr.mxu1 %v3825_v49 }
 0x26c   : > { %8262 = vmatmul.mubr.msk.f32.vlgmr.msra.gmra.mrb[6].mxu0 %vm624_vm12, %v8915_v8  ;;  %v3827_v50 = vsel %vm3823_vm3, %v3810_v25, %v3812_v26  ;;  %8264 = vmatprep.subr.mxu0 %v9067_v19 }
 0x26d   : > { %3846 = vmatpush1.msra.mxu1 %v3824_v53  ;;  %v2601_v17 = vpop.permute.xlu0 %2600  ;;  %8265 = vmatpush3.msra.mxu0 %v8685_v61 }
 0x26e   : > { %3916 = vmatprep.subr.mxu1 %v3827_v50  ;;  %v2611_v27 = vsel %vm2602_vm0, %v8982_v39, %v2601_v17  ;;  %3909 = vmatprep.mubr.f32.mxu1 %v9067_v19 }
 0x26f   : > { %v3814_v8 = vpop.permute.xlu1 %3813  ;;  %8266 = vmatprep.mubr.msk.f32.mxu0 %vm8534_vm10, %v9067_v19  ;;  %8269 = vmatprep.subr.mxu0 %v9067_v19 }
 0x270   : > { %8098 = vmatmul.mubr.msk.f32.vlgmr.msra.gmra.mrb[14].mxu1 %vm624_vm12, %v8097_v58  ;;  %8267 = vmatmul.mubr.msk.f32.vlgmr.msra.gmra.mrb[8].mxu0 %vm624_vm12, %v8943_v24  ;;  %v3828_v30 = vsel %vm3823_vm3, %v3812_v26, %v3814_v8  ;;  %v4251_v26 = vrot.slane %v4232_v1, %v4250_v14 }
 0x271   : > { %3917 = vmatpush1.msra.mxu1 %v3826_v54  ;;  %v3816_v61 = vpop.permute.xlu0 %3815  ;;  %8270 = vmatpush3.msra.mxu0 %v2611_v27 }
 0x272   : > { %3980 = vmatprep.mubr.f32.mxu1 %v9067_v19  ;;  %v3829_v60 = vsel %vm3823_vm3, %v3814_v8, %v3816_v61  ;;  %8271 = vmatprep.mubr.msk.f32.mxu0 %vm8534_vm10, %v9067_v19 }
 0x273   : > { %v3008_v28 = vpop.permute.xlu1 %3007  ;;  %3987 = vmatprep.subr.mxu1 %v3829_v60  ;;  %8274 = vmatprep.subr.mxu0 %v9067_v19  ;;  %v4259_v60 = vrot.slane %v4232_v1, %v4258_v29 }
 0x274   : > { %v3018_v31 = vsel %vm3009_vm1, %v9008_v2, %v3008_v28  ;;  %8099 = vmatmul.mubr.msk.f32.vlgmr.msra.gmra.mrb[16].mxu1 %vm624_vm12, %v8097_v58  ;;  %8272 = vmatmul.mubr.msk.f32.vlgmr.msra.gmra.mrb[10].mxu0 %vm624_vm12, %v8969_v59  ;;  %v4262_v28 = vsub.s32 6, %v9121_v55 }
 0x275   : > { %3988 = vmatpush1.msra.mxu1 %v3828_v30  ;;  %v3818_v24 = vpop.permute.xlu0 %3817  ;;  %8275 = vmatpush3.msra.mxu0 %v3018_v31 }
 0x276   : > { %4051 = vmatprep.mubr.f32.mxu1 %v9067_v19  ;;  %8276 = vmatprep.mubr.msk.f32.mxu0 %vm8534_vm10, %v9067_v19  ;;  %v3830_v35 = vsel %vm3823_vm3, %v3816_v61, %v3818_v24 }
 0x277   : > { %v3820_v32 = vpop.permute.xlu1 %3819  ;;  %8279 = vmatprep.subr.mxu0 %v9067_v19 }
 0x278   : > { %8100 = vmatmul.mubr.msk.f32.vlgmr.msra.gmra.mrb[18].mxu1 %vm624_vm12, %v8097_v58  ;;  %v3831_v33 = vsel %vm3823_vm3, %v3818_v24, %v3820_v32  ;;  %8277 = vmatmul.mubr.msk.f32.vlgmr.msra.gmra.mrb[12].mxu0 %vm624_vm12, %v8997_v52 }
 0x279   : > { %4058 = vmatprep.subr.mxu1 %v3831_v33  ;;  %v3415_v59 = vpop.permute.xlu0 %3414  ;;  %4122 = vmatprep.mubr.f32.mxu1 %v9067_v19  ;;  %v4266_v33 = vsub.s32 7, %v9121_v55 }
 0x27a   : > { %v3425_v36 = vsel %vm3416_vm2, %v9045_v34, %v3415_v59  ;;  %4059 = vmatpush1.msra.mxu1 %v3830_v35  ;;  %8281 = vmatprep.mubr.msk.f32.mxu0 %vm8534_vm10, %v9067_v19 }
 0x27b   : > { %v3822_v37 = vpop.permute.xlu1 %3821  ;;  %8280 = vmatpush3.msra.mxu0 %v3425_v36  ;;  %8309 = vmatprep.subr.mxu1 %v9067_v19 }
 0x27c   : > { %v3832_v38 = vsel %vm3823_vm3, %v3820_v32, %v3822_v37  ;;  %8101 = vmatmul.mubr.msk.f32.vlgmr.msra.gmra.mrb[20].mxu1 %vm624_vm12, %v8097_v58  ;;  %8284 = vmatprep.subr.mxu0 %v9067_v19 }
 0x27d   : > { %8282 = vmatmul.mubr.msk.f32.vlgmr.msra.gmra.mrb[14].mxu0 %vm624_vm12, %v9025_v12  ;;  %8311 = vmatprep.mubr.msk.f32.mxu1 %vm8534_vm10, %v9067_v19  ;;  %v4243_v12 = vrot.slane %v4232_v1, %v4242_v43 }
 0x27e   : > { %8285 = vmatpush3.msra.mxu0 %v3832_v38  ;;  %8286 = vmatprep.mubr.msk.f32.mxu0 %vm8534_vm10, %v9067_v19 }
 0x281   : > { %8287 = vmatmul.mubr.msk.f32.vlgmr.msra.gmra.mrb[16].mxu0 %vm624_vm12, %v8097_v58  ;;  %v4255_v58 = vrot.slane %v4232_v1, %v4254_v20 }
 0x282   : > { %4428 = vmatprep.mubr.f32.mxu0 %v9067_v19 }
 0x28a   : > { %v9128_v2 = vpop.permute.xlu0 %4211 }
 0x28e   : > { %v4324_v9 = vpop.permute.xlu0 %4323 }
 0x2cd   : > { %v978_v39 = vpop.f32.mrb[22].mxu1 }
 0x2ce   : > { %v8248_v40 = vpop.f32.mrb[23].mxu1 }
 0x336   : > { %v1374_v41 = vpop.f32.mrb[2].mxu0 }
 0x337   : > { %v1375_v42 = vadd.f32 %v1374_v41, %v978_v39  ;;  %v8253_v44 = vpop.f32.mrb[3].mxu0  ;;  %v4263_v39 = vrot.slane %v4232_v1, %v4262_v28 }
 0x33a   : > { %v1772_v48 = vpop.f32.mrb[4].mxu0 }
 0x33b   : > { %v1784_v51 = vadd.f32 %v1772_v48, %v1375_v42  ;;  %v8258_v52 = vpop.f32.mrb[5].mxu0  ;;  %v4267_v48 = vrot.slane %v4232_v1, %v4266_v33 }
 0x33f   : > { %v2179_v56 = vpop.f32.mrb[6].mxu0 }
 0x340   : > { %v2191_v57 = vadd.f32 %v2179_v56, %v1784_v51  ;;  %v8263_v62 = vpop.f32.mrb[7].mxu0 }
 0x343   : > { %v3911_v3 = vpop.f32.mrb[14].mxu1  ;;  %v2547_v6 = vpop.f32.mrb[8].mxu0 }
 0x344   : > { %v4214_v4 = vadd.f32 %v9128_v2, %v3911_v3  ;;  %v3913_v7 = vpop.f32.mrb[15].mxu1  ;;  %v2559_v10 = vadd.f32 %v2547_v6, %v2191_v57  ;;  %v8268_v13 = vpop.f32.mrb[9].mxu0  ;;  %v8103_v3 = vld [vmem:[%s9573_s2 + $0x8] ss:$0 sm:$0xff] }
 0x345   : > { %v4215_v11 = vadd.f32 %v9128_v2, %v3913_v7  ;;  %v9249_v6 = vld [vmem:[%s9574_s3 + $0x68] sm:$0xff]  ;;  %v8105_v13 = vld [vmem:[%s9574_s3 + $0x50] sm:$0xff] }
 0x346   : > { %v4223_v15 = vmax.f32 %v4214_v4, 0.0 }
 0x347   : > { %v4224_v16 = vmax.f32 %v4215_v11, 0.0  ;;  %v3982_v18 = vpop.f32.mrb[16].mxu1  ;;  %v2974_v25 = vpop.f32.mrb[10].mxu0 }
 0x348   : > { %v9135_v21 = vmul.f32 %v4239_v5, %v4223_v15  ;;  %v4216_v22 = vadd.f32 %v9128_v2, %v3982_v18  ;;  %v3984_v34 = vpop.f32.mrb[17].mxu1  ;;  %v2986_v45 = vadd.f32 %v2974_v25, %v2559_v10  ;;  %v8273_v49 = vpop.f32.mrb[11].mxu0 }
 0x349   : > { %v9139_v0 = vmul.f32 %v4243_v12, %v4224_v16  ;;  %v4217_v47 = vadd.f32 %v9128_v2, %v3984_v34 }
 0x34a   : > { %4290 = vst [vmem:[#allocation2 + $0x8] sm:$0xff] %v9135_v21  ;;  %v4225_v53 = vmax.f32 %v4216_v22, 0.0  ;;  %4325 = vrot.lane.b32.xlu1 %v9135_v21, %s8532_s21 }
 0x34b   : > { %4291 = vst [vmem:[#allocation2 + $0x10] sm:$0xff] %v9139_v0  ;;  %v4226_v50 = vmax.f32 %v4217_v47, 0.0  ;;  %v4053_v17 = vpop.f32.mrb[18].mxu1  ;;  %v3381_v54 = vpop.f32.mrb[12].mxu0 }
 0x34c   : > { %v9146_v27 = vmul.f32 %v4247_v23, %v4225_v53  ;;  %v4218_v8 = vadd.f32 %v9128_v2, %v4053_v17  ;;  %v4055_v61 = vpop.f32.mrb[19].mxu1  ;;  %v3393_v31 = vadd.f32 %v3381_v54, %v2986_v45  ;;  %v8278_v32 = vpop.f32.mrb[13].mxu0  ;;  %v8104_v54 = vld [vmem:[%s9574_s3 + $0x48] sm:$0xff] }
 0x34d   : > { %v9150_v30 = vmul.f32 %v4251_v26, %v4226_v50  ;;  %v4219_v24 = vadd.f32 %v9128_v2, %v4055_v61 }
 0x34e   : > { %4292 = vst [vmem:[#allocation2 + $0x18] sm:$0xff] %v9146_v27  ;;  %v4227_v35 = vmax.f32 %v4218_v8, 0.0  ;;  %4327 = vrot.lane.b32.xlu1 %v9139_v0, %s8532_s21 }
 0x34f   : > { %4293 = vst [vmem:[#allocation2 + $0x20] sm:$0xff] %v9150_v30  ;;  %v4228_v59 = vmax.f32 %v4219_v24, 0.0  ;;  %v4124_v36 = vpop.f32.mrb[20].mxu1  ;;  %4331 = vrot.lane.b32.xlu0 %v9150_v30, %s8532_s21 }
 0x350   : > { %v9160_v37 = vmul.f32 %v4255_v58, %v4227_v35  ;;  %v4220_v38 = vadd.f32 %v9128_v2, %v4124_v36  ;;  %v3788_v40 = vpop.f32.mrb[14].mxu0  ;;  %v4126_v41 = vpop.f32.mrb[21].mxu1 }
 0x351   : > { %v9163_v42 = vmul.f32 %v4259_v60, %v4228_v59  ;;  %v3800_v44 = vadd.f32 %v3788_v40, %v3393_v31  ;;  %v4221_v46 = vadd.f32 %v9128_v2, %v4126_v41  ;;  %v8283_v51 = vpop.f32.mrb[15].mxu0 }
 0x352   : > { %4294 = vst [vmem:[#allocation2 + $0x28] sm:$0xff] %v9160_v37  ;;  %v4229_v52 = vmax.f32 %v4220_v38, 0.0  ;;  %4329 = vrot.lane.b32.xlu1 %v9146_v27, %s8532_s21 }
 0x353   : > { %4295 = vst [vmem:[#allocation2 + $0x30] sm:$0xff] %v9163_v42  ;;  %v4230_v55 = vmax.f32 %v4221_v46, 0.0  ;;  %4335 = vrot.lane.b32.xlu0 %v9163_v42, %s8532_s21 }
 0x354   : > { %v9172_v56 = vmul.f32 %v4263_v39, %v4229_v52  ;;  %v4195_v57 = vpop.f32.mrb[16].mxu0 }
 0x355   : > { %v9174_v62 = vmul.f32 %v4267_v48, %v4230_v55  ;;  %v4207_v63 = vadd.f32 %v4195_v57, %v3800_v44  ;;  %v8288_v1 = vpop.f32.mrb[17].mxu0  ;;  %v8158_v44 = vld [vmem:[%s9575_s4 + $0x8] sm:$0xff]  ;;  %v8116_v57 = vld [vmem:[%s9574_s3 + $0x58] sm:$0xff] }
 0x356   : > { %4296 = vst [vmem:[#allocation2 + $0x38] sm:$0xff] %v9172_v56  ;;  %4333 = vrot.lane.b32.xlu1 %v9160_v37, %s8532_s21 }
 0x357   : > { %4297 = vst [vmem:[#allocation2 + $0x40] sm:$0xff] %v9174_v62  ;;  %v4222_v43 = vadd.f32 %v9128_v2, %v4207_v63  ;;  %4339 = vrot.lane.b32.xlu0 %v9174_v62, %s8532_s21  ;;  %v8505_v2 = vld [vmem:[#allocation2] sm:$0xff] }
 0x359   : > { %v4231_v4 = vmax.f32 %v4222_v43, 0.0 }
 0x35a   : > { %4337 = vrot.lane.b32.xlu1 %v9172_v56, %s8532_s21 }
 0x35b   : > { %v9188_v5 = vmul.f32 %v8103_v3, %v4231_v4  ;;  %4720 = vrot.lane.b32.xlu0 %v9135_v21, %s8533_s22 }
 0x35d   : > { %4298 = vst [vmem:[#allocation2 + $0x48] sm:$0xff] %v9188_v5  ;;  %8310 = vmatpush3.msra.mxu1 %v9188_v5 }
 0x35e   : > { %4341 = vrot.lane.b32.xlu1 %v9188_v5, %s8532_s21  ;;  %8314 = vmatprep.subr.mxu1 %v9067_v19  ;;  %s9557_s21 = scalar_lea.vmem %s9576_s5, %s8468_s10 }
 0x35f   : > { %4718 = vrot.lane.b32.xlu0 %v8505_v2, %s8533_s22  ;;  %8312 = vmatmul.mubr.msk.f32.vlgmr.msra.gmra.mrb[24].mxu1 %vm624_vm12, %v9249_v6 }
 0x360   : > { %8316 = vmatprep.mubr.msk.f32.mxu1 %vm8534_vm10, %v9067_v19 }
 0x362   : > { %4722 = vrot.lane.b32.xlu1 %v9139_v0, %s8533_s22 }
 0x363   : > { %4726 = vrot.lane.b32.xlu0 %v9150_v30, %s8533_s22 }
 0x366   : > { %4724 = vrot.lane.b32.xlu1 %v9146_v27, %s8533_s22 }
 0x367   : > { %4730 = vrot.lane.b32.xlu0 %v9163_v42, %s8533_s22 }
 0x36a   : > { %4728 = vrot.lane.b32.xlu1 %v9160_v37, %s8533_s22 }
 0x36b   : > { %4734 = vrot.lane.b32.xlu0 %v9174_v62, %s8533_s22 }
 0x36e   : > { %4732 = vrot.lane.b32.xlu1 %v9172_v56, %s8533_s22 }
 0x36f   : > { %5117 = vrot.lane.b32.xlu0 %v9135_v21, %s8536_s23 }
 0x372   : > { %4736 = vrot.lane.b32.xlu1 %v9188_v5, %s8533_s22 }
 0x373   : > { %5115 = vrot.lane.b32.xlu0 %v8505_v2, %s8536_s23 }
 0x376   : > { %5119 = vrot.lane.b32.xlu1 %v9139_v0, %s8536_s23 }
 0x377   : > { %5123 = vrot.lane.b32.xlu0 %v9150_v30, %s8536_s23 }
 0x37a   : > { %5121 = vrot.lane.b32.xlu1 %v9146_v27, %s8536_s23 }
 0x37b   : > { %5127 = vrot.lane.b32.xlu0 %v9163_v42, %s8536_s23 }
 0x37e   : > { %5125 = vrot.lane.b32.xlu1 %v9160_v37, %s8536_s23 }
 0x37f   : > { %5131 = vrot.lane.b32.xlu0 %v9174_v62, %s8536_s23 }
 0x382   : > { %5129 = vrot.lane.b32.xlu1 %v9172_v56, %s8536_s23 }
 0x383   : > { %5523 = vrot.lane.b32.xlu0 %v9135_v21, %s8537_s24 }
 0x386   : > { %5133 = vrot.lane.b32.xlu1 %v9188_v5, %s8536_s23 }
 0x387   : > { %5521 = vrot.lane.b32.xlu0 %v8505_v2, %s8537_s24 }
 0x38a   : > { %5525 = vrot.lane.b32.xlu1 %v9139_v0, %s8537_s24 }
 0x38b   : > { %5529 = vrot.lane.b32.xlu0 %v9150_v30, %s8537_s24 }
 0x38e   : > { %5527 = vrot.lane.b32.xlu1 %v9146_v27, %s8537_s24 }
 0x38f   : > { %5533 = vrot.lane.b32.xlu0 %v9163_v42, %s8537_s24 }
 0x392   : > { %5531 = vrot.lane.b32.xlu1 %v9160_v37, %s8537_s24 }
 0x393   : > { %5537 = vrot.lane.b32.xlu0 %v9174_v62, %s8537_s24 }
 0x396   : > { %5535 = vrot.lane.b32.xlu1 %v9172_v56, %s8537_s24 }
 0x397   : > { %6317 = vrot.lane.b32.xlu0 %v9139_v0, %s8519_s6 }
 0x39a   : > { %5539 = vrot.lane.b32.xlu1 %v9188_v5, %s8537_s24 }
 0x39b   : > { %6315 = vrot.lane.b32.xlu0 %v9135_v21, %s8519_s6 }
 0x39e   : > { %6319 = vrot.lane.b32.xlu1 %v9146_v27, %s8519_s6 }
 0x39f   : > { %6323 = vrot.lane.b32.xlu0 %v9160_v37, %s8519_s6 }
 0x3a2   : > { %6321 = vrot.lane.b32.xlu1 %v9150_v30, %s8519_s6 }
 0x3a3   : > { %6327 = vrot.lane.b32.xlu0 %v9172_v56, %s8519_s6 }
 0x3a6   : > { %6325 = vrot.lane.b32.xlu1 %v9163_v42, %s8519_s6 }
 0x3a7   : > { %6331 = vrot.lane.b32.xlu0 %v9188_v5, %s8519_s6 }
 0x3aa   : > { %6723 = vrot.lane.b32.xlu1 %v9139_v0, %s8538_s25 }
 0x3ab   : > { %6725 = vrot.lane.b32.xlu0 %v9146_v27, %s8538_s25 }
 0x3ae   : > { %6721 = vrot.lane.b32.xlu1 %v9135_v21, %s8538_s25 }
 0x3af   : > { %6727 = vrot.lane.b32.xlu0 %v9150_v30, %s8538_s25 }
 0x3b2   : > { %6729 = vrot.lane.b32.xlu1 %v9160_v37, %s8538_s25 }
 0x3b3   : > { %6731 = vrot.lane.b32.xlu0 %v9163_v42, %s8538_s25 }
 0x3b6   : > { %6733 = vrot.lane.b32.xlu1 %v9172_v56, %s8538_s25 }
 0x3b7   : > { %7129 = vrot.lane.b32.xlu0 %v9139_v0, %s8539_s26 }
 0x3ba   : > { %6329 = vrot.lane.b32.xlu1 %v9174_v62, %s8519_s6 }
 0x3bb   : > { %7127 = vrot.lane.b32.xlu0 %v9135_v21, %s8539_s26 }
 0x3bc   : > { %v4326_v7 = vpop.permute.xlu1 %4325 }
 0x3bd   : > { %v4343_v14 = vsel %vm605_vm11, %v4324_v9, %v4326_v7 }
 0x3be   : > { %6737 = vrot.lane.b32.xlu1 %v9188_v5, %s8538_s25 }
 0x3bf   : > { %7135 = vrot.lane.b32.xlu0 %v9160_v37, %s8539_s26 }
 0x3c0   : > { %v4328_v10 = vpop.permute.xlu1 %4327 }
 0x3c1   : > { %v4332_v11 = vpop.permute.xlu0 %4331  ;;  %v4344_v12 = vsel %vm605_vm11, %v4326_v7, %v4328_v10 }
 0x3c2   : > { %7131 = vrot.lane.b32.xlu1 %v9146_v27, %s8539_s26  ;;  %4364 = vmatprep.subr.mxu0 %v4344_v12 }
 0x3c3   : > { %6735 = vrot.lane.b32.xlu0 %v9174_v62, %s8538_s25  ;;  %4365 = vmatpush1.msra.mxu0 %v4343_v14 }
 0x3c4   : > { %v4330_v15 = vpop.permute.xlu1 %4329  ;;  %8106 = vmatmul.mubr.msk.f32.vlgmr.msra.gmra.mrb[18].mxu0 %vm624_vm12, %v8105_v13 }
 0x3c5   : > { %v4345_v16 = vsel %vm605_vm11, %v4328_v10, %v4330_v15  ;;  %v4336_v18 = vpop.permute.xlu0 %4335  ;;  %v4346_v20 = vsel %vm605_vm11, %v4330_v15, %v4332_v11  ;;  %4499 = vmatprep.mubr.f32.mxu0 %v9067_v19 }
 0x3c6   : > { %7133 = vrot.lane.b32.xlu1 %v9150_v30, %s8539_s26  ;;  %4435 = vmatprep.subr.mxu0 %v4346_v20 }
 0x3c7   : > { %7139 = vrot.lane.b32.xlu0 %v9172_v56, %s8539_s26  ;;  %4436 = vmatpush1.msra.mxu0 %v4345_v16 }
 0x3c8   : > { %v4334_v22 = vpop.permute.xlu1 %4333  ;;  %8107 = vmatmul.mubr.msk.f32.vlgmr.msra.gmra.mrb[20].mxu0 %vm624_vm12, %v8105_v13 }
 0x3c9   : > { %v4347_v23 = vsel %vm605_vm11, %v4332_v11, %v4334_v22  ;;  %v4340_v25 = vpop.permute.xlu0 %4339  ;;  %v4348_v34 = vsel %vm605_vm11, %v4334_v22, %v4336_v18  ;;  %4570 = vmatprep.mubr.f32.mxu0 %v9067_v19 }
 0x3ca   : > { %7137 = vrot.lane.b32.xlu1 %v9163_v42, %s8539_s26  ;;  %4506 = vmatprep.subr.mxu0 %v4348_v34 }
 0x3cb   : > { %7143 = vrot.lane.b32.xlu0 %v9188_v5, %s8539_s26  ;;  %4507 = vmatpush1.msra.mxu0 %v4347_v23  ;;  %v8122_v23 = vld [vmem:[%s9574_s3 + $0x60] sm:$0xff] }
 0x3cc   : > { %v4338_v29 = vpop.permute.xlu1 %4337  ;;  %8108 = vmatmul.mubr.msk.f32.vlgmr.msra.gmra.mrb[22].mxu0 %vm624_vm12, %v8105_v13 }
 0x3cd   : > { %v4349_v45 = vsel %vm605_vm11, %v4336_v18, %v4338_v29  ;;  %v4721_v47 = vpop.permute.xlu0 %4720  ;;  %v4350_v26 = vsel %vm605_vm11, %v4338_v29, %v4340_v25  ;;  %4641 = vmatprep.mubr.f32.mxu0 %v9067_v19 }
 0x3ce   : > { %6333 = vrot.lane.b32.xlu1 %v9067_v19, %s8519_s6  ;;  %4577 = vmatprep.subr.mxu0 %v4350_v26 }
 0x3cf   : > { %7535 = vrot.lane.b32.xlu0 %v9139_v0, %s8540_s29  ;;  %4578 = vmatpush1.msra.mxu0 %v4349_v45 }
 0x3d0   : > { %v4342_v49 = vpop.permute.xlu1 %4341  ;;  %8109 = vmatmul.mubr.msk.f32.vlgmr.msra.gmra.mrb[24].mxu0 %vm624_vm12, %v8105_v13  ;;  %8289 = vmatprep.subr.mxu0 %v9067_v19 }
 0x3d1   : > { %v4351_v53 = vsel %vm605_vm11, %v4340_v25, %v4342_v49  ;;  %v4719_v50 = vpop.permute.xlu0 %4718  ;;  %8291 = vmatprep.mubr.msk.f32.mxu0 %vm8534_vm10, %v9067_v19 }
 0x3d2   : > { %7537 = vrot.lane.b32.xlu1 %v9146_v27, %s8540_s29  ;;  %8290 = vmatpush3.msra.mxu0 %v4351_v53  ;;  %v4738_v61 = vsel %vm1002_vm13, %v4719_v50, %v4721_v47 }
 0x3d3   : > { %7533 = vrot.lane.b32.xlu0 %v9135_v21, %s8540_s29 }
 0x3d4   : > { %v4723_v17 = vpop.permute.xlu1 %4722  ;;  %8292 = vmatmul.mubr.msk.f32.vlgmr.msra.gmra.mrb[26].mxu0 %vm624_vm12, %v8105_v13 }
 0x3d5   : > { %v4727_v58 = vpop.permute.xlu0 %4726  ;;  %v4739_v8 = vsel %vm1002_vm13, %v4721_v47, %v4723_v17  ;;  %4823 = vmatprep.mubr.f32.mxu0 %v9067_v19 }
 0x3d6   : > { %6739 = vrot.lane.b32.xlu1 %v9067_v19, %s8538_s25  ;;  %4759 = vmatprep.subr.mxu0 %v4739_v8 }
 0x3d7   : > { %7539 = vrot.lane.b32.xlu0 %v9150_v30, %s8540_s29  ;;  %4760 = vmatpush1.msra.mxu0 %v4738_v61 }
 0x3d8   : > { %v4725_v60 = vpop.permute.xlu1 %4724  ;;  %8111 = vmatmul.mubr.msk.f32.vlgmr.msra.gmra.mrb[18].mxu0 %vm624_vm12, %v8104_v54 }
 0x3d9   : > { %v4740_v28 = vsel %vm1002_vm13, %v4723_v17, %v4725_v60  ;;  %v4731_v31 = vpop.permute.xlu0 %4730  ;;  %v4741_v24 = vsel %vm1002_vm13, %v4725_v60, %v4727_v58  ;;  %4894 = vmatprep.mubr.f32.mxu0 %v9067_v19 }
 0x3da   : > { %7141 = vrot.lane.b32.xlu1 %v9174_v62, %s8539_s26  ;;  %4830 = vmatprep.subr.mxu0 %v4741_v24 }
 0x3db   : > { %7145 = vrot.lane.b32.xlu0 %v9067_v19, %s8539_s26  ;;  %4831 = vmatpush1.msra.mxu0 %v4740_v28 }
 0x3dc   : > { %v4729_v32 = vpop.permute.xlu1 %4728  ;;  %8112 = vmatmul.mubr.msk.f32.vlgmr.msra.gmra.mrb[20].mxu0 %vm624_vm12, %v8104_v54 }
 0x3dd   : > { %v4742_v33 = vsel %vm1002_vm13, %v4727_v58, %v4729_v32  ;;  %v4735_v35 = vpop.permute.xlu0 %4734  ;;  %v4743_v59 = vsel %vm1002_vm13, %v4729_v32, %v4731_v31  ;;  %4965 = vmatprep.mubr.f32.mxu0 %v9067_v19 }
 0x3de   : > { %7541 = vrot.lane.b32.xlu1 %v9160_v37, %s8540_s29  ;;  %4901 = vmatprep.subr.mxu0 %v4743_v59 }
 0x3df   : > { %7545 = vrot.lane.b32.xlu0 %v9172_v56, %s8540_s29  ;;  %4902 = vmatpush1.msra.mxu0 %v4742_v33 }
 0x3e0   : > { %v4733_v36 = vpop.permute.xlu1 %4732  ;;  %8113 = vmatmul.mubr.msk.f32.vlgmr.msra.gmra.mrb[22].mxu0 %vm624_vm12, %v8104_v54 }
 0x3e1   : > { %v4744_v38 = vsel %vm1002_vm13, %v4731_v31, %v4733_v36  ;;  %v5118_v39 = vpop.permute.xlu0 %5117  ;;  %v4745_v40 = vsel %vm1002_vm13, %v4733_v36, %v4735_v35  ;;  %5036 = vmatprep.mubr.f32.mxu0 %v9067_v19 }
 0x3e2   : > { %7543 = vrot.lane.b32.xlu1 %v9163_v42, %s8540_s29  ;;  %4972 = vmatprep.subr.mxu0 %v4745_v40 }
 0x3e3   : > { %7549 = vrot.lane.b32.xlu0 %v9188_v5, %s8540_s29  ;;  %4973 = vmatpush1.msra.mxu0 %v4744_v38 }
 0x3e4   : > { %v4737_v41 = vpop.permute.xlu1 %4736  ;;  %8114 = vmatmul.mubr.msk.f32.vlgmr.msra.gmra.mrb[24].mxu0 %vm624_vm12, %v8104_v54  ;;  %8294 = vmatprep.subr.mxu0 %v9067_v19 }
 0x3e5   : > { %v4746_v46 = vsel %vm1002_vm13, %v4735_v35, %v4737_v41  ;;  %v5116_v48 = vpop.permute.xlu0 %5115  ;;  %8296 = vmatprep.mubr.msk.f32.mxu0 %vm8534_vm10, %v9067_v19 }
 0x3e6   : > { %7547 = vrot.lane.b32.xlu1 %v9174_v62, %s8540_s29  ;;  %8295 = vmatpush3.msra.mxu0 %v4746_v46  ;;  %v5135_v63 = vsel %vm1400_vm14, %v5116_v48, %v5118_v39 }
 0x3e7   : > { %7941 = vperm.xlu0 %8503, %v8158_v44  }
 0x3e8   : > { %v5120_v51 = vpop.permute.xlu1 %5119  ;;  %8297 = vmatmul.mubr.msk.f32.vlgmr.msra.gmra.mrb[28].mxu0 %vm624_vm12, %v8104_v54 }
 0x3e9   : > { %v5124_v52 = vpop.permute.xlu0 %5123  ;;  %v5136_v55 = vsel %vm1400_vm14, %v5118_v39, %v5120_v51  ;;  %5220 = vmatprep.mubr.f32.mxu0 %v9067_v19 }
 0x3ea   : > { %7551 = vrot.lane.b32.xlu1 %v9067_v19, %s8540_s29  ;;  %5156 = vmatprep.subr.mxu0 %v5136_v55 }
 0x3eb   : > { %5157 = vmatpush1.msra.mxu0 %v5135_v63 }
 0x3ec   : > { %v5122_v1 = vpop.permute.xlu1 %5121  ;;  %8117 = vmatmul.mubr.msk.f32.vlgmr.msra.gmra.mrb[18].mxu0 %vm624_vm12, %v8116_v57 }
 0x3ed   : > { %v5137_v43 = vsel %vm1400_vm14, %v5120_v51, %v5122_v1  ;;  %v5128_v3 = vpop.permute.xlu0 %5127  ;;  %v5138_v4 = vsel %vm1400_vm14, %v5122_v1, %v5124_v52  ;;  %5291 = vmatprep.mubr.f32.mxu0 %v9067_v19 }
 0x3ee   : > { %5227 = vmatprep.subr.mxu0 %v5138_v4 }
 0x3ef   : > { %5228 = vmatpush1.msra.mxu0 %v5137_v43 }
 0x3f0   : > { %v5126_v5 = vpop.permute.xlu1 %5125  ;;  %8118 = vmatmul.mubr.msk.f32.vlgmr.msra.gmra.mrb[20].mxu0 %vm624_vm12, %v8116_v57 }
 0x3f1   : > { %v5139_v2 = vsel %vm1400_vm14, %v5124_v52, %v5126_v5  ;;  %v5132_v7 = vpop.permute.xlu0 %5131  ;;  %v5140_v9 = vsel %vm1400_vm14, %v5126_v5, %v5128_v3  ;;  %5362 = vmatprep.mubr.f32.mxu0 %v9067_v19 }
 0x3f2   : > { %5298 = vmatprep.subr.mxu0 %v5140_v9 }
 0x3f3   : > { %5299 = vmatpush1.msra.mxu0 %v5139_v2 }
 0x3f4   : > { %v5130_v10 = vpop.permute.xlu1 %5129  ;;  %8119 = vmatmul.mubr.msk.f32.vlgmr.msra.gmra.mrb[22].mxu0 %vm624_vm12, %v8116_v57 }
 0x3f5   : > { %v5141_v11 = vsel %vm1400_vm14, %v5128_v3, %v5130_v10  ;;  %v5524_v12 = vpop.permute.xlu0 %5523  ;;  %v5142_v13 = vsel %vm1400_vm14, %v5130_v10, %v5132_v7  ;;  %5433 = vmatprep.mubr.f32.mxu0 %v9067_v19  ;;  %v8140_v3 = vld [vmem:[%s9574_s3 + $0x78] sm:$0xff] }
 0x3f6   : > { %5369 = vmatprep.subr.mxu0 %v5142_v13 }
 0x3f7   : > { %5370 = vmatpush1.msra.mxu0 %v5141_v11 }
 0x3f8   : > { %v5134_v14 = vpop.permute.xlu1 %5133  ;;  %8120 = vmatmul.mubr.msk.f32.vlgmr.msra.gmra.mrb[24].mxu0 %vm624_vm12, %v8116_v57  ;;  %8299 = vmatprep.subr.mxu0 %v9067_v19 }
 0x3f9   : > { %v5143_v15 = vsel %vm1400_vm14, %v5132_v7, %v5134_v14  ;;  %v5522_v16 = vpop.permute.xlu0 %5521  ;;  %8301 = vmatprep.mubr.msk.f32.mxu0 %vm8534_vm10, %v9067_v19 }
 0x3fa   : > { %8300 = vmatpush3.msra.mxu0 %v5143_v15  ;;  %v5541_v25 = vsel %vm1807_vm15, %v5522_v16, %v5524_v12 }
 0x3fc   : > { %v5526_v18 = vpop.permute.xlu1 %5525  ;;  %8302 = vmatmul.mubr.msk.f32.vlgmr.msra.gmra.mrb[30].mxu0 %vm624_vm12, %v8116_v57 }
 0x3fd   : > { %v5530_v20 = vpop.permute.xlu0 %5529  ;;  %v5542_v22 = vsel %vm1807_vm15, %v5524_v12, %v5526_v18  ;;  %5626 = vmatprep.mubr.f32.mxu0 %v9067_v19 }
 0x3fe   : > { %5562 = vmatprep.subr.mxu0 %v5542_v22 }
 0x3ff   : > { %5563 = vmatpush1.msra.mxu0 %v5541_v25 }
 0x400   : > { %v5528_v34 = vpop.permute.xlu1 %5527  ;;  %8123 = vmatmul.mubr.msk.f32.vlgmr.msra.gmra.mrb[18].mxu0 %vm624_vm12, %v8122_v23 }
 0x401   : > { %v5543_v29 = vsel %vm1807_vm15, %v5526_v18, %v5528_v34  ;;  %v5534_v45 = vpop.permute.xlu0 %5533  ;;  %v5544_v47 = vsel %vm1807_vm15, %v5528_v34, %v5530_v20  ;;  %5697 = vmatprep.mubr.f32.mxu0 %v9067_v19  ;;  %v8146_v34 = vld [vmem:[%s9574_s3 + $0x80] sm:$0xff] }
 0x402   : > { %5633 = vmatprep.subr.mxu0 %v5544_v47 }
 0x403   : > { %5634 = vmatpush1.msra.mxu0 %v5543_v29 }
 0x404   : > { %v5532_v26 = vpop.permute.xlu1 %5531  ;;  %8124 = vmatmul.mubr.msk.f32.vlgmr.msra.gmra.mrb[20].mxu0 %vm624_vm12, %v8122_v23 }
 0x405   : > { %v5545_v49 = vsel %vm1807_vm15, %v5530_v20, %v5532_v26  ;;  %v5538_v53 = vpop.permute.xlu0 %5537  ;;  %v5546_v50 = vsel %vm1807_vm15, %v5532_v26, %v5534_v45  ;;  %5768 = vmatprep.mubr.f32.mxu0 %v9067_v19 }
 0x406   : > { %5704 = vmatprep.subr.mxu0 %v5546_v50 }
 0x407   : > { %5705 = vmatpush1.msra.mxu0 %v5545_v49 }
 0x408   : > { %v5536_v17 = vpop.permute.xlu1 %5535  ;;  %8125 = vmatmul.mubr.msk.f32.vlgmr.msra.gmra.mrb[22].mxu0 %vm624_vm12, %v8122_v23 }
 0x409   : > { %v5547_v58 = vsel %vm1807_vm15, %v5534_v45, %v5536_v17  ;;  %v6318_v8 = vpop.permute.xlu0 %6317  ;;  %v5548_v54 = vsel %vm1807_vm15, %v5536_v17, %v5538_v53  ;;  %5839 = vmatprep.mubr.f32.mxu0 %v9067_v19 }
 0x40a   : > { %5775 = vmatprep.subr.mxu0 %v5548_v54 }
 0x40b   : > { %5776 = vmatpush1.msra.mxu0 %v5547_v58  ;;  %v8506_v58 = vld [vmem:[#allocation2 + $0x50] sm:$0xff] }
 0x40c   : > { %v5540_v61 = vpop.permute.xlu1 %5539  ;;  %8126 = vmatmul.mubr.msk.f32.vlgmr.msra.gmra.mrb[24].mxu0 %vm624_vm12, %v8122_v23  ;;  %8304 = vmatprep.subr.mxu0 %v9067_v19 }
 0x40d   : > { %v5549_v60 = vsel %vm1807_vm15, %v5538_v53, %v5540_v61  ;;  %v6316_v28 = vpop.permute.xlu0 %6315  ;;  %8306 = vmatprep.mubr.msk.f32.mxu0 %vm8534_vm10, %v9067_v19 }
 0x40e   : > { %8305 = vmatpush3.msra.mxu0 %v5549_v60 }
 0x40f   : > { %5930 = vmatprep.subr.mxu0 %v9139_v0 }
 0x410   : > { %v6320_v31 = vpop.permute.xlu1 %6319  ;;  %8307 = vmatmul.mubr.msk.f32.vlgmr.msra.gmra.mrb[32].mxu0 %vm624_vm12, %v8122_v23 }
 0x411   : > { %5931 = vmatpush1.msra.mxu0 %v9135_v21  ;;  %v6324_v24 = vpop.permute.xlu0 %6323  ;;  %5994 = vmatprep.mubr.f32.mxu0 %v9067_v19 }
 0x412   : > { %6001 = vmatprep.subr.mxu0 %v9150_v30 }
 0x414   : > { %v6322_v32 = vpop.permute.xlu1 %6321  ;;  %8129 = vmatmul.mubr.msk.f32.vlgmr.msra.gmra.mrb[18].mxu0 %vm624_vm12, %v9249_v6 }
 0x415   : > { %6002 = vmatpush1.msra.mxu0 %v9146_v27  ;;  %v6328_v33 = vpop.permute.xlu0 %6327  ;;  %6065 = vmatprep.mubr.f32.mxu0 %v9067_v19  ;;  %v6336_v27 = vsel %vm2602_vm0, %v6318_v8, %v6320_v31  ;;  %v6337_v36 = vsel %vm2602_vm0, %v6320_v31, %v6322_v32 }
 0x416   : > { %6072 = vmatprep.subr.mxu0 %v9163_v42 }
 0x418   : > { %v6326_v0 = vpop.permute.xlu1 %6325  ;;  %8130 = vmatmul.mubr.msk.f32.vlgmr.msra.gmra.mrb[20].mxu0 %vm624_vm12, %v9249_v6 }
 0x419   : > { %6073 = vmatpush1.msra.mxu0 %v9160_v37  ;;  %v9451_v21 = vpop.permute.xlu0 %6331  ;;  %6136 = vmatprep.mubr.f32.mxu0 %v9067_v19  ;;  %v6335_v37 = vsel %vm2602_vm0, %v6316_v28, %v6318_v8  ;;  %v6339_v40 = vsel %vm2602_vm0, %v6324_v24, %v6326_v0 }
 0x41a   : > { %6143 = vmatprep.subr.mxu0 %v9174_v62  ;;  %v6338_v62 = vsel %vm2602_vm0, %v6322_v32, %v6324_v24 }
 0x41c   : > { %v6724_v30 = vpop.permute.xlu1 %6723  ;;  %8131 = vmatmul.mubr.msk.f32.vlgmr.msra.gmra.mrb[22].mxu0 %vm624_vm12, %v9249_v6 }
 0x41d   : > { %6144 = vmatpush1.msra.mxu0 %v9172_v56  ;;  %v6726_v42 = vpop.permute.xlu0 %6725  ;;  %6207 = vmatprep.mubr.f32.mxu0 %v9067_v19  ;;  %v9468_v56 = vld [vmem:[%s9574_s3 + $0x70] sm:$0xff] }
 0x41e   : > { %6356 = vmatprep.subr.mxu0 %v6336_v27  ;;  %v6742_v55 = vsel %vm3009_vm1, %v6724_v30, %v6726_v42 }
 0x420   : > { %v6722_v35 = vpop.permute.xlu1 %6721  ;;  %8132 = vmatmul.mubr.msk.f32.vlgmr.msra.gmra.mrb[24].mxu0 %vm624_vm12, %v9249_v6  ;;  %v6340_v6 = vsel %vm2602_vm0, %v6326_v0, %v6328_v33 }
 0x421   : > { %6357 = vmatpush1.msra.mxu0 %v6335_v37  ;;  %v6728_v59 = vpop.permute.xlu0 %6727  ;;  %6420 = vmatprep.mubr.f32.mxu0 %v9067_v19  ;;  %v6741_v57 = vsel %vm3009_vm1, %v6722_v35, %v6724_v30 }
 0x422   : > { %6427 = vmatprep.subr.mxu0 %v6338_v62  ;;  %v6743_v4 = vsel %vm3009_vm1, %v6726_v42, %v6728_v59 }
 0x424   : > { %v6730_v38 = vpop.permute.xlu1 %6729  ;;  %8135 = vmatmul.mubr.msk.f32.vlgmr.msra.gmra.mrb[18].mxu0 %vm624_vm12, %v9468_v56 }
 0x425   : > { %6428 = vmatpush1.msra.mxu0 %v6337_v36  ;;  %v6732_v39 = vpop.permute.xlu0 %6731  ;;  %6491 = vmatprep.mubr.f32.mxu0 %v9067_v19  ;;  %v6744_v43 = vsel %vm3009_vm1, %v6728_v59, %v6730_v38 }
 0x426   : > { %6498 = vmatprep.subr.mxu0 %v6340_v6  ;;  %v6745_v9 = vsel %vm3009_vm1, %v6730_v38, %v6732_v39 }
 0x428   : > { %v6734_v41 = vpop.permute.xlu1 %6733  ;;  %8136 = vmatmul.mubr.msk.f32.vlgmr.msra.gmra.mrb[20].mxu0 %vm624_vm12, %v9468_v56 }
 0x429   : > { %6499 = vmatpush1.msra.mxu0 %v6339_v40  ;;  %v7130_v44 = vpop.permute.xlu0 %7129  ;;  %6562 = vmatprep.mubr.f32.mxu0 %v9067_v19  ;;  %v6746_v2 = vsel %vm3009_vm1, %v6732_v39, %v6734_v41 }
 0x42c   : > { %v6330_v46 = vpop.permute.xlu1 %6329  ;;  %8137 = vmatmul.mubr.msk.f32.vlgmr.msra.gmra.mrb[22].mxu0 %vm624_vm12, %v9468_v56 }
 0x42d   : > { %v6341_v48 = vsel %vm2602_vm0, %v6328_v33, %v6330_v46  ;;  %v7128_v51 = vpop.permute.xlu0 %7127  ;;  %v6342_v52 = vsel %vm2602_vm0, %v6330_v46, %v9451_v21  ;;  %6633 = vmatprep.mubr.f32.mxu0 %v9067_v19  ;;  %v8152_v33 = vld [vmem:[%s9574_s3 + $0x88] sm:$0xff] }
 0x42e   : > { %6569 = vmatprep.subr.mxu0 %v6342_v52  ;;  %v7147_v18 = vsel %vm3416_vm2, %v7128_v51, %v7130_v44 }
 0x42f   : > { %6570 = vmatpush1.msra.mxu0 %v6341_v48 }
 0x430   : > { %v6738_v63 = vpop.permute.xlu1 %6737  ;;  %8138 = vmatmul.mubr.msk.f32.vlgmr.msra.gmra.mrb[24].mxu0 %vm624_vm12, %v9468_v56  ;;  %6762 = vmatprep.subr.mxu0 %v6742_v55 }
 0x431   : > { %6763 = vmatpush1.msra.mxu0 %v6741_v57  ;;  %v7136_v1 = vpop.permute.xlu0 %7135  ;;  %6826 = vmatprep.mubr.f32.mxu0 %v9067_v19 }
 0x432   : > { %6833 = vmatprep.subr.mxu0 %v6744_v43  ;;  %v6280_v38 = vpop.f32.mrb[24].mxu1 }
 0x433   : > { %v8313_v6 = vpop.f32.mrb[25].mxu1 }
 0x434   : > { %v7132_v5 = vpop.permute.xlu1 %7131  ;;  %8141 = vmatmul.mubr.msk.f32.vlgmr.msra.gmra.mrb[18].mxu0 %vm624_vm12, %v8140_v3 }
 0x435   : > { %6834 = vmatpush1.msra.mxu0 %v6743_v4  ;;  %v6736_v7 = vpop.permute.xlu0 %6735  ;;  %6897 = vmatprep.mubr.f32.mxu0 %v9067_v19  ;;  %v7148_v15 = vsel %vm3416_vm2, %v7130_v44, %v7132_v5 }
 0x436   : > { %6904 = vmatprep.subr.mxu0 %v6746_v2  ;;  %v6748_v11 = vsel %vm3009_vm1, %v6736_v7, %v6738_v63  ;;  %v6747_v13 = vsel %vm3009_vm1, %v6734_v41, %v6736_v7 }
 0x438   : > { %v7134_v10 = vpop.permute.xlu1 %7133  ;;  %8142 = vmatmul.mubr.msk.f32.vlgmr.msra.gmra.mrb[20].mxu0 %vm624_vm12, %v8140_v3 }
 0x439   : > { %6905 = vmatpush1.msra.mxu0 %v6745_v9  ;;  %v7140_v12 = vpop.permute.xlu0 %7139  ;;  %6968 = vmatprep.mubr.f32.mxu0 %v9067_v19  ;;  %v7150_v23 = vsel %vm3416_vm2, %v7134_v10, %v7136_v1  ;;  %v7149_v29 = vsel %vm3416_vm2, %v7132_v5, %v7134_v10 }
 0x43a   : > { %6975 = vmatprep.subr.mxu0 %v6748_v11 }
 0x43c   : > { %v7138_v14 = vpop.permute.xlu1 %7137  ;;  %8143 = vmatmul.mubr.msk.f32.vlgmr.msra.gmra.mrb[22].mxu0 %vm624_vm12, %v8140_v3 }
 0x43d   : > { %6976 = vmatpush1.msra.mxu0 %v6747_v13  ;;  %v7144_v16 = vpop.permute.xlu0 %7143  ;;  %7039 = vmatprep.mubr.f32.mxu0 %v9067_v19  ;;  %v7152_v47 = vsel %vm3416_vm2, %v7138_v14, %v7140_v12  ;;  %v7151_v49 = vsel %vm3416_vm2, %v7136_v1, %v7138_v14 }
 0x43e   : > { %7168 = vmatprep.subr.mxu0 %v7148_v15 }
 0x440   : > { %v6334_v20 = vpop.permute.xlu1 %6333  ;;  %8144 = vmatmul.mubr.msk.f32.vlgmr.msra.gmra.mrb[24].mxu0 %vm624_vm12, %v8140_v3 }
 0x441   : > { %v6343_v22 = vsel %vm2602_vm0, %v9451_v21, %v6334_v20  ;;  %7169 = vmatpush1.msra.mxu0 %v7147_v18  ;;  %v7536_v25 = vpop.permute.xlu0 %7535  ;;  %7232 = vmatprep.mubr.f32.mxu0 %v9067_v19 }
 0x442   : > { %7239 = vmatprep.subr.mxu0 %v7150_v23  ;;  %8315 = vmatpush3.msra.mxu1 %v6343_v22 }
 0x443   : > { %8317 = vmatmul.mubr.msk.f32.vlgmr.msra.gmra.mrb[26].mxu1 %vm624_vm12, %v9468_v56  ;;  %8319 = vmatprep.subr.mxu1 %v9067_v19 }
 0x444   : > { %v7538_v45 = vpop.permute.xlu1 %7537  ;;  %8147 = vmatmul.mubr.msk.f32.vlgmr.msra.gmra.mrb[18].mxu0 %vm624_vm12, %v8146_v34  ;;  %8321 = vmatprep.mubr.msk.f32.mxu1 %vm8534_vm10, %v9067_v19 }
 0x445   : > { %7240 = vmatpush1.msra.mxu0 %v7149_v29  ;;  %v7534_v26 = vpop.permute.xlu0 %7533  ;;  %7303 = vmatprep.mubr.f32.mxu0 %v9067_v19  ;;  %v7554_v31 = vsel %vm3823_vm3, %v7536_v25, %v7538_v45 }
 0x446   : > { %7310 = vmatprep.subr.mxu0 %v7152_v47  ;;  %v7553_v24 = vsel %vm3823_vm3, %v7534_v26, %v7536_v25 }
 0x448   : > { %v6740_v53 = vpop.permute.xlu1 %6739  ;;  %8148 = vmatmul.mubr.msk.f32.vlgmr.msra.gmra.mrb[20].mxu0 %vm624_vm12, %v8146_v34 }
 0x449   : > { %v6749_v50 = vsel %vm3009_vm1, %v6738_v63, %v6740_v53  ;;  %7311 = vmatpush1.msra.mxu0 %v7151_v49  ;;  %v7540_v17 = vpop.permute.xlu0 %7539  ;;  %7374 = vmatprep.mubr.f32.mxu0 %v8506_v58 }
 0x44a   : > { %8320 = vmatpush3.msra.mxu1 %v6749_v50  ;;  %v7555_v21 = vsel %vm3823_vm3, %v7538_v45, %v7540_v17 }
 0x44b   : > { %8322 = vmatmul.mubr.msk.f32.vlgmr.msra.gmra.mrb[28].mxu1 %vm624_vm12, %v8140_v3  ;;  %8324 = vmatprep.subr.mxu1 %v8506_v58 }
 0x44c   : > { %v7142_v8 = vpop.permute.xlu1 %7141  ;;  %8149 = vmatmul.mubr.msk.f32.vlgmr.msra.gmra.mrb[22].mxu0 %vm624_vm12, %v8146_v34  ;;  %8326 = vmatprep.mubr.msk.f32.mxu1 %vm8534_vm10, %v8506_v58 }
 0x44d   : > { %v7153_v19 = vsel %vm3416_vm2, %v7140_v12, %v7142_v8  ;;  %v7146_v54 = vpop.permute.xlu0 %7145  ;;  %v7154_v61 = vsel %vm3416_vm2, %v7142_v8, %v7144_v16  ;;  %7445 = vmatprep.mubr.f32.mxu0 %v8506_v58 }
 0x44e   : > { %v7155_v60 = vsel %vm3416_vm2, %v7144_v16, %v7146_v54  ;;  %7381 = vmatprep.subr.mxu0 %v7154_v61 }
 0x44f   : > { %7382 = vmatpush1.msra.mxu0 %v7153_v19  ;;  %8325 = vmatpush3.msra.mxu1 %v7155_v60 }
 0x450   : > { %v7542_v28 = vpop.permute.xlu1 %7541  ;;  %8150 = vmatmul.mubr.msk.f32.vlgmr.msra.gmra.mrb[24].mxu0 %vm624_vm12, %v8146_v34  ;;  %8327 = vmatmul.mubr.msk.f32.vlgmr.msra.gmra.mrb[30].mxu1 %vm624_vm12, %v8146_v34 }
 0x451   : > { %7574 = vmatprep.subr.mxu0 %v7554_v31  ;;  %v7556_v32 = vsel %vm3823_vm3, %v7540_v17, %v7542_v28  ;;  %7638 = vmatprep.mubr.f32.mxu0 %v8506_v58  ;;  %v7546_v0 = vpop.permute.xlu0 %7545 }
 0x452   : > { %7575 = vmatpush1.msra.mxu0 %v7553_v24  ;;  %8329 = vmatprep.subr.mxu1 %v8506_v58 }
 0x453   : > { %7645 = vmatprep.subr.mxu0 %v7556_v32  ;;  %8331 = vmatprep.mubr.msk.f32.mxu1 %vm8534_vm10, %v8506_v58 }
 0x454   : > { %v7544_v30 = vpop.permute.xlu1 %7543  ;;  %8153 = vmatmul.mubr.msk.f32.vlgmr.msra.gmra.mrb[18].mxu0 %vm624_vm12, %v8152_v33 }
 0x455   : > { %7646 = vmatpush1.msra.mxu0 %v7555_v21  ;;  %v7558_v27 = vsel %vm3823_vm3, %v7544_v30, %v7546_v0  ;;  %7709 = vmatprep.mubr.f32.mxu0 %v8506_v58  ;;  %v7557_v42 = vsel %vm3823_vm3, %v7542_v28, %v7544_v30  ;;  %v7550_v37 = vpop.permute.xlu0 %7549 }
 0x456   : > { %7716 = vmatprep.subr.mxu0 %v7558_v27 }
 0x458   : > { %v7548_v35 = vpop.permute.xlu1 %7547  ;;  %8154 = vmatmul.mubr.msk.f32.vlgmr.msra.gmra.mrb[20].mxu0 %vm624_vm12, %v8152_v33 }
 0x459   : > { %7717 = vmatpush1.msra.mxu0 %v7557_v42  ;;  %v7560_v62 = vsel %vm3823_vm3, %v7548_v35, %v7550_v37  ;;  %7780 = vmatprep.mubr.f32.mxu0 %v8506_v58  ;;  %v7559_v59 = vsel %vm3823_vm3, %v7546_v0, %v7548_v35 }
 0x45a   : > { %7787 = vmatprep.subr.mxu0 %v7560_v62 }
 0x45c   : > { %v7552_v56 = vpop.permute.xlu1 %7551  ;;  %8155 = vmatmul.mubr.msk.f32.vlgmr.msra.gmra.mrb[22].mxu0 %vm624_vm12, %v8152_v33 }
 0x45d   : > { %v7561_v36 = vsel %vm3823_vm3, %v7550_v37, %v7552_v56  ;;  %7788 = vmatpush1.msra.mxu0 %v7559_v59  ;;  %7851 = vmatprep.mubr.f32.mxu0 %v8506_v58 }
 0x45e   : > { %8330 = vmatpush3.msra.mxu1 %v7561_v36 }
 0x45f   : > { %8332 = vmatmul.mubr.msk.f32.vlgmr.msra.gmra.mrb[32].mxu1 %vm624_vm12, %v8152_v33 }
 0x460   : > { %8156 = vmatmul.mubr.msk.f32.vlgmr.msra.gmra.mrb[24].mxu0 %vm624_vm12, %v8152_v33 }
 0x466   : > { %v7942_v12 = vpop.permute.xlu0 %7941 }
 0x4a7   : > { %v4714_v39 = vpop.f32.mrb[26].mxu0 }
 0x4a8   : > { %v8293_v40 = vpop.f32.mrb[27].mxu0 }
 0x4bb   : > { %v5109_v41 = vpop.f32.mrb[28].mxu0 }
 0x4bc   : > { %v5110_v44 = vadd.f32 %v5109_v41, %v4714_v39  ;;  %v8298_v46 = vpop.f32.mrb[29].mxu0 }
 0x4cf   : > { %v5506_v48 = vpop.f32.mrb[30].mxu0 }
 0x4d0   : > { %v5518_v51 = vadd.f32 %v5506_v48, %v5110_v44  ;;  %v8303_v52 = vpop.f32.mrb[31].mxu0 }
 0x4e3   : > { %v5912_v55 = vpop.f32.mrb[32].mxu0 }
 0x4e4   : > { %v5924_v57 = vadd.f32 %v5912_v55, %v5518_v51  ;;  %v8308_v63 = vpop.f32.mrb[33].mxu0 }
 0x4e6   : > { %v6292_v1 = vadd.f32 %v6280_v38, %v5924_v57 }
 0x516   : > { %v6706_v43 = vpop.f32.mrb[26].mxu1 }
 0x517   : > { %v6718_v3 = vadd.f32 %v6706_v43, %v6292_v1  ;;  %v8318_v4 = vpop.f32.mrb[27].mxu1 }
 0x51e   : > { %v7112_v5 = vpop.f32.mrb[28].mxu1 }
 0x51f   : > { %v7124_v2 = vadd.f32 %v7112_v5, %v6718_v3  ;;  %v8323_v7 = vpop.f32.mrb[29].mxu1 }
 0x523   : > { %v7518_v9 = vpop.f32.mrb[30].mxu1 }
 0x524   : > { %v7530_v10 = vadd.f32 %v7518_v9, %v7124_v2  ;;  %v8328_v11 = vpop.f32.mrb[31].mxu1 }
 0x527   : > { %v7640_v13 = vpop.f32.mrb[18].mxu0 }
 0x528   : > { %v7944_v14 = vadd.f32 %v7942_v12, %v7640_v13  ;;  %v7642_v15 = vpop.f32.mrb[19].mxu0 }
 0x529   : > { %v7945_v16 = vadd.f32 %v7942_v12, %v7642_v15 }
 0x52a   : > { %v7953_v18 = vmax.f32 %v7944_v14, 0.0 }
 0x52b   : > { %v7954_v20 = vmax.f32 %v7945_v16, 0.0  ;;  %v7711_v22 = vpop.f32.mrb[20].mxu0 }
 0x52c   : > { %7962 = vst [vmem:[%s9557_s21] sm:$0xff] %v7953_v18  ;;  %v7946_v23 = vadd.f32 %v7942_v12, %v7711_v22  ;;  %v7713_v25 = vpop.f32.mrb[21].mxu0 }
 0x52d   : > { %7963 = vst [vmem:[%s9557_s21 + $0x8] sm:$0xff] %v7954_v20  ;;  %v7947_v34 = vadd.f32 %v7942_v12, %v7713_v25 }
 0x52e   : > { %v7955_v29 = vmax.f32 %v7946_v23, 0.0 }
 0x52f   : > { %v7956_v45 = vmax.f32 %v7947_v34, 0.0  ;;  %v7782_v47 = vpop.f32.mrb[22].mxu0 }
 0x530   : > { %7964 = vst [vmem:[%s9557_s21 + $0x10] sm:$0xff] %v7955_v29  ;;  %v7948_v26 = vadd.f32 %v7942_v12, %v7782_v47  ;;  %v7784_v49 = vpop.f32.mrb[23].mxu0 }
 0x531   : > { %7965 = vst [vmem:[%s9557_s21 + $0x18] sm:$0xff] %v7956_v45  ;;  %v7949_v53 = vadd.f32 %v7942_v12, %v7784_v49 }
 0x532   : > { %v7957_v50 = vmax.f32 %v7948_v26, 0.0  ;;  %v7924_v17 = vpop.f32.mrb[32].mxu1 }
 0x533   : > { %v7958_v58 = vmax.f32 %v7949_v53, 0.0  ;;  %v7936_v8 = vadd.f32 %v7924_v17, %v7530_v10  ;;  %v7853_v19 = vpop.f32.mrb[24].mxu0  ;;  %v8333_v54 = vpop.f32.mrb[33].mxu1 }
 0x534   : > { %7966 = vst [vmem:[%s9557_s21 + $0x20] sm:$0xff] %v7957_v50  ;;  %v7950_v61 = vadd.f32 %v7942_v12, %v7853_v19  ;;  %v7855_v60 = vpop.f32.mrb[25].mxu0 }
 0x535   : > { %7967 = vst [vmem:[%s9557_s21 + $0x28] sm:$0xff] %v7958_v58  ;;  %v7952_v28 = vadd.f32 %v7942_v12, %v7936_v8  ;;  %v7951_v31 = vadd.f32 %v7942_v12, %v7855_v60 }
 0x536   : > { %v7959_v24 = vmax.f32 %v7950_v61, 0.0 }
 0x537   : > { %v7961_v32 = vmax.f32 %v7952_v28, 0.0  ;;  %v7960_v33 = vmax.f32 %v7951_v31, 0.0 }
 0x538   : > { %7968 = vst [vmem:[%s9557_s21 + $0x30] sm:$0xff] %v7959_v24 }
 0x539   : > { %7970 = vst [vmem:[%s9557_s21 + $0x40] sm:$0xff] %v7961_v32  ;;  %7969 = vst [vmem:[%s9557_s21 + $0x38] sm:$0xff] %v7960_v33 }
 0x53a PF: > { %s15_s18 = sadd.s32 1, %s8513_s18  }
 0x53b   : > { %p12_p4 = scmp.ge.s32.totalorder %s15_s18, 4  }
 0x53d   :  { %14 = sbr.rel (!%p12_p4) target bundleno = 1 (0x1), region = 88 }

</bundles_post_ra>
